<compile_context>
chip_gen: v7x
topology: tpu7x:2x2x1
jax: 0.10.0
libtpu: 0.0.40
codegen_flags: <defaults>
</compile_context>

<pallas_src>
import functools

import jax
import jax.numpy as jnp
import numpy as np
from jax import lax
from jax.experimental import pallas as pl
from jax.experimental.pallas import tpu as pltpu

EPS = 1e-5
LANES = 128                      # channel dims padded to a multiple of this
TM_ROWS = 512                    # target row tile for HBM-bound kernels
VMEM_LIMIT = 48 * 1024 * 1024    # scoped VMEM with headroom (fits v7x 64 MiB)


# ------------------------------ small helpers ------------------------------ #

def _round_up(x, m):
    return (x + m - 1) // m * m


def _pad_last(x, target):
    pad = target - x.shape[-1]
    if pad == 0:
        return x
    return jnp.pad(x, [(0, 0)] * (x.ndim - 1) + [(0, pad)])


def _row_tile(m, target=TM_ROWS):
    tm = min(target, _round_up(m, 8))
    return tm, _round_up(m, tm)


def _compiler_params(*semantics):
    return pltpu.CompilerParams(dimension_semantics=semantics,
                                vmem_limit_bytes=VMEM_LIMIT)


def _stats_to_mean_var(stats, m):
    # stats: (num_tiles, 8, C); row 0 = partial sum, row 1 = partial sum of sq.
    total = jnp.sum(stats, axis=0)
    mean = total[0:1, :] / m
    var = total[1:2, :] / m - mean * mean
    # clamp guards the E[x^2]-E[x]^2 cancellation from producing tiny negatives
    return mean, jnp.maximum(var, 0.0)


# ----------------------------- Pallas kernels ------------------------------ #

def conv3x3_s1_stats_kernel(x_hbm, w_ref, y_ref, stats_ref, slab_ref, sem_ref,
                            *, th, wo):
    """Direct 3x3 stride-1 conv for one (image, row-tile).

    The (th+2, W+2, Cin) halo slab is DMA'd once into VMEM and all 9 taps are
    accumulated with bf16 MXU matmuls (f32 accumulator).  The per-tile BN
    sum / sum-of-squares are emitted as an epilogue (no extra stats pass).
    """
    n = pl.program_id(0)
    t = pl.program_id(1)
    rows = th + 2
    cp = pltpu.make_async_copy(x_hbm.at[n, pl.ds(t * th, rows)],
                               slab_ref, sem_ref)
    cp.start()
    cp.wait()

    cin_p = slab_ref.shape[-1]
    cout_p = y_ref.shape[-1]
    acc = jnp.zeros((th * wo, cout_p), jnp.float32)
    for kh in range(3):
        for kw in range(3):
            a = slab_ref[kh:kh + th, kw:kw + wo, :]           # (th, wo, cin_p)
            a2 = a.reshape(th * wo, cin_p).astype(jnp.bfloat16)
            acc = acc + jnp.dot(a2, w_ref[kh * 3 + kw],
                                preferred_element_type=jnp.float32)
    y_ref[...] = acc

    s = jnp.sum(acc, axis=0, keepdims=True)
    q = jnp.sum(acc * acc, axis=0, keepdims=True)
    stats_ref[...] = jnp.concatenate(
        [s, q, jnp.zeros((6, cout_p), jnp.float32)], axis=0)[None]


def matmul_stats_kernel(a_ref, b_ref, y_ref, stats_ref):
    # im2col matmul (stride-2 fallback) with the BN-stats reduction fused in.
    acc = jnp.dot(a_ref[...], b_ref[...], preferred_element_type=jnp.float32)
    y_ref[...] = acc
    s = jnp.sum(acc, axis=0, keepdims=True)
    q = jnp.sum(acc * acc, axis=0, keepdims=True)
    stats_ref[...] = jnp.concatenate(
        [s, q, jnp.zeros((6, acc.shape[-1]), jnp.float32)], axis=0)[None]


def matmul_bias_kernel(a_ref, b_ref, bias_ref, y_ref):
    # 1x1 conv as a matmul with the bias folded into the kernel.
    y_ref[...] = (jnp.dot(a_ref[...], b_ref[...],
                          preferred_element_type=jnp.float32) + bias_ref[...])


def bn_relu_kernel(y_ref, mean_ref, var_ref, gamma_ref, beta_ref, o_ref, *, eps):
    # relu( (y - mean) * rsqrt(var+eps) * gamma + beta )   (no residual stream)
    inv = lax.rsqrt(var_ref[...] + eps)
    yn = (y_ref[...] - mean_ref[...]) * inv * gamma_ref[...] + beta_ref[...]
    o_ref[...] = jnp.maximum(yn, 0.0).astype(o_ref.dtype)


def bn_relu_add_relu_kernel(y_ref, res_ref, mean_ref, var_ref, gamma_ref,
                            beta_ref, o_ref, *, eps):
    # relu( relu(BN(y)) + residual )
    inv = lax.rsqrt(var_ref[...] + eps)
    yn = (y_ref[...] - mean_ref[...]) * inv * gamma_ref[...] + beta_ref[...]
    o_ref[...] = jnp.maximum(jnp.maximum(yn, 0.0) + res_ref[...],
                             0.0).astype(o_ref.dtype)


# --------------------------- pallas_call wrappers --------------------------- #

def _pick_th(ho, wo, cin_p, cout_p,
             max_out_bytes=2 << 20, max_slab_bytes=8 << 20):
    """Largest row tile th | Ho with (th*Wo) % 8 == 0 that fits the budgets."""
    wp = wo + 2
    for th in range(ho, 0, -1):
        if ho % th:
            continue
        if (th * wo) % 8:
            continue
        if th * wo * cout_p * 4 > max_out_bytes:
            continue
        if (th + 2) * wp * cin_p * 4 > max_slab_bytes:
            continue
        return th
    return None


def conv3x3_s1_fused(x_nhwc, w9, th):
    # x_nhwc: (N, H, W, Cin_p) f32, channels already lane-padded
    # w9:     (9, Cin_p, Cout_p) bf16, tap-major (kh*3+kw)
    n, h, w, cin_p = x_nhwc.shape
    cout_p = w9.shape[-1]
    ho, wo = h, w
    ht = ho // th
    m = n * ho * wo
    x_pad = jnp.pad(x_nhwc, ((0, 0), (1, 1), (1, 1), (0, 0)))

    kernel = functools.partial(conv3x3_s1_stats_kernel, th=th, wo=wo)
    y, stats = pl.pallas_call(
        kernel,
        out_shape=(jax.ShapeDtypeStruct((m, cout_p), jnp.float32),
                   jax.ShapeDtypeStruct((n * ht, 8, cout_p), jnp.float32)),
        grid=(n, ht),
        in_specs=[pl.BlockSpec(memory_space=pl.ANY),                 # halo DMA'd manually
                  pl.BlockSpec((9, cin_p, cout_p), lambda i, t: (0, 0, 0))],
        out_specs=(pl.BlockSpec((th * wo, cout_p),
                                lambda i, t: (i * ht + t, 0)),
                   pl.BlockSpec((1, 8, cout_p),
                                lambda i, t: (i * ht + t, 0, 0))),
        scratch_shapes=[pltpu.VMEM((th + 2, w + 2, cin_p), jnp.float32),
                        pltpu.SemaphoreType.DMA],
        compiler_params=_compiler_params("parallel", "parallel"),
    )(x_pad, w9)
    mean, var = _stats_to_mean_var(stats, m)
    return y, mean, var


def _im2col_3x3(x_nhwc, stride):
    n, h, w, c = x_nhwc.shape
    xp = jnp.pad(x_nhwc, ((0, 0), (1, 1), (1, 1), (0, 0)))
    ho = (h + 2 - 3) // stride + 1
    wo = (w + 2 - 3) // stride + 1
    cols = []
    for kh in range(3):
        for kw in range(3):
            cols.append(xp[:, kh:kh + (ho - 1) * stride + 1:stride,
                           kw:kw + (wo - 1) * stride + 1:stride, :])
    patches = jnp.stack(cols, axis=3)                  # (N, Ho, Wo, 9, C)
    return patches.reshape(n * ho * wo, 9 * c), ho, wo


def conv3x3_im2col_stats(x_nhwc, w_oihw, stride, cout_p):
    # Fallback (stride-2 conv1): bf16 im2col + lane-dense matmul with fused
    # BN-stats epilogue.  K = 9*Cin stays unpadded (full-extent block).
    cout, cin = w_oihw.shape[0], w_oihw.shape[1]
    patches, ho, wo = _im2col_3x3(x_nhwc.astype(jnp.bfloat16), stride)
    m, k = patches.shape
    w2d = jnp.transpose(w_oihw, (2, 3, 1, 0)).reshape(k, cout)
    w2d = _pad_last(w2d, cout_p).astype(jnp.bfloat16)

    tm, mp = _row_tile(m)
    if mp != m:
        patches = jnp.pad(patches, ((0, mp - m), (0, 0)))  # zero rows: stats unaffected
    g = mp // tm
    y, stats = pl.pallas_call(
        matmul_stats_kernel,
        out_shape=(jax.ShapeDtypeStruct((mp, cout_p), jnp.float32),
                   jax.ShapeDtypeStruct((g, 8, cout_p), jnp.float32)),
        grid=(g,),
        in_specs=[pl.BlockSpec((tm, k), lambda i: (i, 0)),
                  pl.BlockSpec((k, cout_p), lambda i: (0, 0))],
        out_specs=(pl.BlockSpec((tm, cout_p), lambda i: (i, 0)),
                   pl.BlockSpec((1, 8, cout_p), lambda i: (i, 0, 0))),
        compiler_params=_compiler_params("parallel"),
    )(patches, w2d)
    mean, var = _stats_to_mean_var(stats, m)
    return y[:m], mean, var, ho, wo


def conv1x1_proj(x_nhwc, w_oihw, bias, stride, cout_p):
    xs = x_nhwc[:, ::stride, ::stride, :]
    n, ho, wo, cin = xs.shape
    m = n * ho * wo
    a = xs.reshape(m, cin).astype(jnp.bfloat16)
    cout = w_oihw.shape[0]
    w2d = _pad_last(w_oihw.reshape(cout, cin).T, cout_p).astype(jnp.bfloat16)
    b = _pad_last(bias.reshape(1, cout).astype(jnp.float32), cout_p)

    tm, mp = _row_tile(m)
    if mp != m:
        a = jnp.pad(a, ((0, mp - m), (0, 0)))
    y = pl.pallas_call(
        matmul_bias_kernel,
        out_shape=jax.ShapeDtypeStruct((mp, cout_p), jnp.float32),
        grid=(mp // tm,),
        in_specs=[pl.BlockSpec((tm, cin), lambda i: (i, 0)),
                  pl.BlockSpec((cin, cout_p), lambda i: (0, 0)),
                  pl.BlockSpec((1, cout_p), lambda i: (0, 0))],
        out_specs=pl.BlockSpec((tm, cout_p), lambda i: (i, 0)),
        compiler_params=_compiler_params("parallel"),
    )(a, w2d, b)
    return y[:m]


def _bn_call(kernel, tensors, params_1c, out_dtype):
    m, c = tensors[0].shape
    tm, mp = _row_tile(m)
    if mp != m:
        tensors = [jnp.pad(t, ((0, mp - m), (0, 0))) for t in tensors]
    out = pl.pallas_call(
        kernel,
        out_shape=jax.ShapeDtypeStruct((mp, c), out_dtype),
        grid=(mp // tm,),
        in_specs=([pl.BlockSpec((tm, c), lambda i: (i, 0)) for _ in tensors]
                  + [pl.BlockSpec((1, c), lambda i: (0, 0)) for _ in params_1c]),
        out_specs=pl.BlockSpec((tm, c), lambda i: (i, 0)),
        compiler_params=_compiler_params("parallel"),
    )(*tensors, *params_1c)
    return out[:m]


def pallas_bn_relu(y, mean, var, gamma, beta, out_dtype=jnp.float32):
    kernel = functools.partial(bn_relu_kernel, eps=EPS)
    return _bn_call(kernel, [y], [mean, var, gamma, beta], out_dtype)


def pallas_bn_relu_add_relu(y, res, mean, var, gamma, beta,
                            out_dtype=jnp.float32):
    kernel = functools.partial(bn_relu_add_relu_kernel, eps=EPS)
    return _bn_call(kernel, [y, res], [mean, var, gamma, beta], out_dtype)


# --------------------------- residual block forward -------------------------- #

def _weights_to_taps(w_oihw, cin_p, cout_p):
    cout, cin = w_oihw.shape[0], w_oihw.shape[1]
    w = jnp.transpose(w_oihw, (2, 3, 1, 0)).reshape(9, cin, cout)
    w = jnp.pad(w, ((0, 0), (0, cin_p - cin), (0, cout_p - cout)))
    return w.astype(jnp.bfloat16)


def _conv3x3_with_stats(x_nhwc, w_oihw, stride, cout_p):
    cin_w = w_oihw.shape[1]
    n, h, w, cin_x = x_nhwc.shape
    cin_p = _round_up(cin_w, LANES)
    th = _pick_th(h, w, cin_p, cout_p) if stride == 1 else None
    if th is not None:
        xp = x_nhwc if cin_x == cin_p else _pad_last(x_nhwc[..., :cin_w], cin_p)
        w9 = _weights_to_taps(w_oihw, cin_p, cout_p)
        y, mean, var = conv3x3_s1_fused(xp, w9, th)
        return y, mean, var, h, w
    # TODO(synk): the stride-2 conv still goes through an im2col slab; a fused
    # strided direct-conv kernel would remove that materialization too.
    return conv3x3_im2col_stats(x_nhwc[..., :cin_w], w_oihw, stride, cout_p)


def residual_block_forward(x_nchw, params, same_shape=True):
    x = jnp.transpose(x_nchw, (0, 2, 3, 1)).astype(jnp.float32)   # NCHW -> NHWC
    n = x.shape[0]
    stride = 1 if same_shape else 2
    cout = params["w1"].shape[0]
    cout_p = _round_up(cout, LANES)

    # conv1 (+ fused BN1 batch stats)
    y1, mean1, var1, ho, wo = _conv3x3_with_stats(x, params["w1"], stride, cout_p)
    m = n * ho * wo

    # BN1 + ReLU (no residual stream)
    h1 = pallas_bn_relu(y1, mean1, var1,
                        _pad_last(params["gamma1"], cout_p),
                        _pad_last(params["beta1"], cout_p))
    h1 = h1.reshape(n, ho, wo, cout_p)

    # conv2 (stride 1, + fused BN2 batch stats)
    y2, mean2, var2, _, _ = _conv3x3_with_stats(h1, params["w2"], 1, cout_p)

    # shortcut
    if same_shape:
        shortcut = _pad_last(x, cout_p).reshape(m, cout_p)
    else:
        shortcut = conv1x1_proj(x, params["w3"], params["b3"], stride, cout_p)

    # BN2 + ReLU + residual add + ReLU (single fused kernel)
    out = pallas_bn_relu_add_relu(y2, shortcut, mean2, var2,
                                  _pad_last(params["gamma2"], cout_p),
                                  _pad_last(params["beta2"], cout_p))
    out = out[:, :cout].reshape(n, ho, wo, cout)
    return jnp.transpose(out, (0, 3, 1, 2))                      # back to NCHW


# ------------------------------ pure-JAX reference --------------------------- #

def ref_residual_block(x, params, same_shape):
    stride = 1 if same_shape else 2

    def conv(x, w, s, pad):
        return lax.conv_general_dilated(
            x, w, (s, s), [(pad, pad), (pad, pad)],
            dimension_numbers=("NCHW", "OIHW", "NCHW"))

    def bn_relu(y, g, b):
        mean = jnp.mean(y, axis=(0, 2, 3), keepdims=True)
        var = jnp.var(y, axis=(0, 2, 3), keepdims=True)
        yn = (y - mean) / jnp.sqrt(var + EPS) * g.reshape(1, -1, 1, 1) \
             + b.reshape(1, -1, 1, 1)
        return jnp.maximum(yn, 0.0)

    out = bn_relu(conv(x, params["w1"], stride, 1), params["gamma1"], params["beta1"])
    out = bn_relu(conv(out, params["w2"], 1, 1), params["gamma2"], params["beta2"])
    if same_shape:
        sc = x
    else:
        sc = conv(x, params["w3"], stride, 0) + params["b3"].reshape(1, -1, 1, 1)
    return jnp.maximum(sc + out, 0.0)


# ----------------------------------- main ------------------------------------ #

def make_params(key, cin, cout, same_shape):
    k1, k2, k3, k4 = jax.random.split(key, 4)
    params = {
        "w1": 0.1 * jax.random.normal(k1, (cout, cin, 3, 3), jnp.float32),
        "w2": 0.1 * jax.random.normal(k2, (cout, cout, 3, 3), jnp.float32),
        "gamma1": jnp.ones((1, cout), jnp.float32),
        "beta1": jnp.zeros((1, cout), jnp.float32),
        "gamma2": jnp.ones((1, cout), jnp.float32),
        "beta2": jnp.zeros((1, cout), jnp.float32),
    }
    if not same_shape:
        params["w3"] = 0.1 * jax.random.normal(k3, (cout, cin, 1, 1), jnp.float32)
        params["b3"] = 0.05 * jax.random.normal(k4, (cout,), jnp.float32)
    return params


if __name__ == "__main__":
    key = jax.random.PRNGKey(0)
    kx, kp1, kp2 = jax.random.split(key, 3)

    x1 = jax.random.normal(kx, (2, 8, 16, 16), jnp.float32)

    # Case 1: same_shape=True (stride 1, identity shortcut)
    p1 = make_params(kp1, 8, 8, same_shape=True)
    y1 = jax.block_until_ready(residual_block_forward(x1, p1, same_shape=True))
    r1 = ref_residual_block(x1, p1, same_shape=True)
    np.testing.assert_allclose(np.asarray(y1), np.asarray(r1), rtol=2e-2, atol=2e-2)

    # Case 2: same_shape=False (stride 2, 1x1 projection shortcut)
    p2 = make_params(kp2, 8, 16, same_shape=False)
    y2 = jax.block_until_ready(residual_block_forward(x1, p2, same_shape=False))
    r2 = ref_residual_block(x1, p2, same_shape=False)
    np.testing.assert_allclose(np.asarray(y2), np.asarray(r2), rtol=2e-2, atol=2e-2)

    print("KERNEL_OK")
</pallas_src>

<mosaic_0001>
module attributes {stable_mosaic.version = 11 : i64} {
  func.func @conv3x3_s1_stats_kernel(%arg0: i32, %arg1: i32, %arg2: memref<2x18x18x128xf32, #tpu.memory_space<any>>, %arg3: memref<9x128x128xbf16, #tpu.memory_space<vmem>>, %arg4: memref<256x128xf32, #tpu.memory_space<vmem>>, %arg5: memref<1x8x128xf32, #tpu.memory_space<vmem>>, %arg6: memref<18x18x128xf32, #tpu.memory_space<vmem>>, %arg7: memref<!tpu.dma_semaphore, #tpu.memory_space<semaphore_mem>>) attributes {dimension_semantics = [#tpu.dimension_semantics<parallel>, #tpu.dimension_semantics<parallel>], iteration_bounds = array<i64: 2, 1>, scalar_prefetch = 0 : i64, scratch_operands = 2 : i64, tpu.core_type = #tpu.core_type<tc>, window_params = [{}, {pipeline_mode = #tpu.pipeline_mode<synchronous>, transform_indices = @transform_1, window_bounds = array<i64: 9, 128, 128>}, {transform_indices = @transform_2, window_bounds = array<i64: 256, 128>}, {transform_indices = @transform_3, window_bounds = array<i64: 1, 8, 128>}]} {
    %c16_i32 = arith.constant 16 : i32
    %0 = arith.muli %arg1, %c16_i32 : i32
    %c0_i32 = arith.constant 0 : i32
    %c0_i32_0 = arith.constant 0 : i32
    %1 = tpu.memref_slice %arg2[%arg0, %0, %c0_i32, %c0_i32_0] : memref<2x18x18x128xf32, #tpu.memory_space<any>> -> memref<1x18x18x128xf32, #tpu.memory_space<any>>
    %2 = tpu.memref_squeeze %1 : memref<1x18x18x128xf32, #tpu.memory_space<any>> -> memref<18x18x128xf32, #tpu.memory_space<any>>
    tpu.enqueue_dma source(%2 : memref<18x18x128xf32, #tpu.memory_space<any>>) target(%arg6 : memref<18x18x128xf32, #tpu.memory_space<vmem>>) target_semaphore(%arg7 : memref<!tpu.dma_semaphore, #tpu.memory_space<semaphore_mem>>)
    %c0_i32_1 = arith.constant 0 : i32
    %c0_i32_2 = arith.constant 0 : i32
    %3 = tpu.memref_slice %arg2[%arg0, %0, %c0_i32_1, %c0_i32_2] : memref<2x18x18x128xf32, #tpu.memory_space<any>> -> memref<1x18x18x128xf32, #tpu.memory_space<any>>
    %4 = tpu.memref_squeeze %3 : memref<1x18x18x128xf32, #tpu.memory_space<any>> -> memref<18x18x128xf32, #tpu.memory_space<any>>
    tpu.wait_dma2 semaphore(%arg7 : memref<!tpu.dma_semaphore, #tpu.memory_space<semaphore_mem>>) src(%4 : memref<18x18x128xf32, #tpu.memory_space<any>>) dst(%arg6 : memref<18x18x128xf32, #tpu.memory_space<vmem>>)
    %cst = arith.constant 0.000000e+00 : f32
    %5 = vector.broadcast %cst : f32 to vector<256x128xf32>
    %c0 = arith.constant 0 : index
    %c0_3 = arith.constant 0 : index
    %c0_4 = arith.constant 0 : index
    %6 = vector.load %arg6[%c0, %c0_3, %c0_4] : memref<18x18x128xf32, #tpu.memory_space<vmem>>, vector<16x16x128xf32>
    %7 = vector.shape_cast %6 : vector<16x16x128xf32> to vector<256x128xf32>
    %8 = arith.truncf %7 : vector<256x128xf32> to vector<256x128xbf16>
    %c0_5 = arith.constant 0 : index
    %c0_6 = arith.constant 0 : index
    %c0_7 = arith.constant 0 : index
    %9 = vector.load %arg3[%c0_5, %c0_6, %c0_7] : memref<9x128x128xbf16, #tpu.memory_space<vmem>>, vector<1x128x128xbf16>
    %10 = vector.shape_cast %9 : vector<1x128x128xbf16> to vector<128x128xbf16>
    %cst_8 = arith.constant dense<0.000000e+00> : vector<256x128xf32>
    %11 = tpu.matmul %8, %10, %cst_8 {dimension_numbers = #tpu.dot_dimension_numbers<[1], [0], [0], [1], [0, 0, 1, 1], [], []>} : vector<256x128xbf16>, vector<128x128xbf16>, vector<256x128xf32> -> vector<256x128xf32>
    %12 = arith.addf %5, %11 : vector<256x128xf32>
    %c0_9 = arith.constant 0 : index
    %c1 = arith.constant 1 : index
    %c0_10 = arith.constant 0 : index
    %13 = vector.load %arg6[%c0_9, %c1, %c0_10] : memref<18x18x128xf32, #tpu.memory_space<vmem>>, vector<16x16x128xf32>
    %14 = vector.shape_cast %13 : vector<16x16x128xf32> to vector<256x128xf32>
    %15 = arith.truncf %14 : vector<256x128xf32> to vector<256x128xbf16>
    %c1_11 = arith.constant 1 : index
    %c0_12 = arith.constant 0 : index
    %c0_13 = arith.constant 0 : index
    %16 = vector.load %arg3[%c1_11, %c0_12, %c0_13] : memref<9x128x128xbf16, #tpu.memory_space<vmem>>, vector<1x128x128xbf16>
    %17 = vector.shape_cast %16 : vector<1x128x128xbf16> to vector<128x128xbf16>
    %cst_14 = arith.constant dense<0.000000e+00> : vector<256x128xf32>
    %18 = tpu.matmul %15, %17, %cst_14 {dimension_numbers = #tpu.dot_dimension_numbers<[1], [0], [0], [1], [0, 0, 1, 1], [], []>} : vector<256x128xbf16>, vector<128x128xbf16>, vector<256x128xf32> -> vector<256x128xf32>
    %19 = arith.addf %12, %18 : vector<256x128xf32>
    %c0_15 = arith.constant 0 : index
    %c2 = arith.constant 2 : index
    %c0_16 = arith.constant 0 : index
    %20 = vector.load %arg6[%c0_15, %c2, %c0_16] : memref<18x18x128xf32, #tpu.memory_space<vmem>>, vector<16x16x128xf32>
    %21 = vector.shape_cast %20 : vector<16x16x128xf32> to vector<256x128xf32>
    %22 = arith.truncf %21 : vector<256x128xf32> to vector<256x128xbf16>
    %c2_17 = arith.constant 2 : index
    %c0_18 = arith.constant 0 : index
    %c0_19 = arith.constant 0 : index
    %23 = vector.load %arg3[%c2_17, %c0_18, %c0_19] : memref<9x128x128xbf16, #tpu.memory_space<vmem>>, vector<1x128x128xbf16>
    %24 = vector.shape_cast %23 : vector<1x128x128xbf16> to vector<128x128xbf16>
    %cst_20 = arith.constant dense<0.000000e+00> : vector<256x128xf32>
    %25 = tpu.matmul %22, %24, %cst_20 {dimension_numbers = #tpu.dot_dimension_numbers<[1], [0], [0], [1], [0, 0, 1, 1], [], []>} : vector<256x128xbf16>, vector<128x128xbf16>, vector<256x128xf32> -> vector<256x128xf32>
    %26 = arith.addf %19, %25 : vector<256x128xf32>
    %c1_21 = arith.constant 1 : index
    %c0_22 = arith.constant 0 : index
    %c0_23 = arith.constant 0 : index
    %27 = vector.load %arg6[%c1_21, %c0_22, %c0_23] : memref<18x18x128xf32, #tpu.memory_space<vmem>>, vector<16x16x128xf32>
    %28 = vector.shape_cast %27 : vector<16x16x128xf32> to vector<256x128xf32>
    %29 = arith.truncf %28 : vector<256x128xf32> to vector<256x128xbf16>
    %c3 = arith.constant 3 : index
    %c0_24 = arith.constant 0 : index
    %c0_25 = arith.constant 0 : index
    %30 = vector.load %arg3[%c3, %c0_24, %c0_25] : memref<9x128x128xbf16, #tpu.memory_space<vmem>>, vector<1x128x128xbf16>
    %31 = vector.shape_cast %30 : vector<1x128x128xbf16> to vector<128x128xbf16>
    %cst_26 = arith.constant dense<0.000000e+00> : vector<256x128xf32>
    %32 = tpu.matmul %29, %31, %cst_26 {dimension_numbers = #tpu.dot_dimension_numbers<[1], [0], [0], [1], [0, 0, 1, 1], [], []>} : vector<256x128xbf16>, vector<128x128xbf16>, vector<256x128xf32> -> vector<256x128xf32>
    %33 = arith.addf %26, %32 : vector<256x128xf32>
    %c1_27 = arith.constant 1 : index
    %c1_28 = arith.constant 1 : index
    %c0_29 = arith.constant 0 : index
    %34 = vector.load %arg6[%c1_27, %c1_28, %c0_29] : memref<18x18x128xf32, #tpu.memory_space<vmem>>, vector<16x16x128xf32>
    %35 = vector.shape_cast %34 : vector<16x16x128xf32> to vector<256x128xf32>
    %36 = arith.truncf %35 : vector<256x128xf32> to vector<256x128xbf16>
    %c4 = arith.constant 4 : index
    %c0_30 = arith.constant 0 : index
    %c0_31 = arith.constant 0 : index
    %37 = vector.load %arg3[%c4, %c0_30, %c0_31] : memref<9x128x128xbf16, #tpu.memory_space<vmem>>, vector<1x128x128xbf16>
    %38 = vector.shape_cast %37 : vector<1x128x128xbf16> to vector<128x128xbf16>
    %cst_32 = arith.constant dense<0.000000e+00> : vector<256x128xf32>
    %39 = tpu.matmul %36, %38, %cst_32 {dimension_numbers = #tpu.dot_dimension_numbers<[1], [0], [0], [1], [0, 0, 1, 1], [], []>} : vector<256x128xbf16>, vector<128x128xbf16>, vector<256x128xf32> -> vector<256x128xf32>
    %40 = arith.addf %33, %39 : vector<256x128xf32>
    %c1_33 = arith.constant 1 : index
    %c2_34 = arith.constant 2 : index
    %c0_35 = arith.constant 0 : index
    %41 = vector.load %arg6[%c1_33, %c2_34, %c0_35] : memref<18x18x128xf32, #tpu.memory_space<vmem>>, vector<16x16x128xf32>
    %42 = vector.shape_cast %41 : vector<16x16x128xf32> to vector<256x128xf32>
    %43 = arith.truncf %42 : vector<256x128xf32> to vector<256x128xbf16>
    %c5 = arith.constant 5 : index
    %c0_36 = arith.constant 0 : index
    %c0_37 = arith.constant 0 : index
    %44 = vector.load %arg3[%c5, %c0_36, %c0_37] : memref<9x128x128xbf16, #tpu.memory_space<vmem>>, vector<1x128x128xbf16>
    %45 = vector.shape_cast %44 : vector<1x128x128xbf16> to vector<128x128xbf16>
    %cst_38 = arith.constant dense<0.000000e+00> : vector<256x128xf32>
    %46 = tpu.matmul %43, %45, %cst_38 {dimension_numbers = #tpu.dot_dimension_numbers<[1], [0], [0], [1], [0, 0, 1, 1], [], []>} : vector<256x128xbf16>, vector<128x128xbf16>, vector<256x128xf32> -> vector<256x128xf32>
    %47 = arith.addf %40, %46 : vector<256x128xf32>
    %c2_39 = arith.constant 2 : index
    %c0_40 = arith.constant 0 : index
    %c0_41 = arith.constant 0 : index
    %48 = vector.load %arg6[%c2_39, %c0_40, %c0_41] : memref<18x18x128xf32, #tpu.memory_space<vmem>>, vector<16x16x128xf32>
    %49 = vector.shape_cast %48 : vector<16x16x128xf32> to vector<256x128xf32>
    %50 = arith.truncf %49 : vector<256x128xf32> to vector<256x128xbf16>
    %c6 = arith.constant 6 : index
    %c0_42 = arith.constant 0 : index
    %c0_43 = arith.constant 0 : index
    %51 = vector.load %arg3[%c6, %c0_42, %c0_43] : memref<9x128x128xbf16, #tpu.memory_space<vmem>>, vector<1x128x128xbf16>
    %52 = vector.shape_cast %51 : vector<1x128x128xbf16> to vector<128x128xbf16>
    %cst_44 = arith.constant dense<0.000000e+00> : vector<256x128xf32>
    %53 = tpu.matmul %50, %52, %cst_44 {dimension_numbers = #tpu.dot_dimension_numbers<[1], [0], [0], [1], [0, 0, 1, 1], [], []>} : vector<256x128xbf16>, vector<128x128xbf16>, vector<256x128xf32> -> vector<256x128xf32>
    %54 = arith.addf %47, %53 : vector<256x128xf32>
    %c2_45 = arith.constant 2 : index
    %c1_46 = arith.constant 1 : index
    %c0_47 = arith.constant 0 : index
    %55 = vector.load %arg6[%c2_45, %c1_46, %c0_47] : memref<18x18x128xf32, #tpu.memory_space<vmem>>, vector<16x16x128xf32>
    %56 = vector.shape_cast %55 : vector<16x16x128xf32> to vector<256x128xf32>
    %57 = arith.truncf %56 : vector<256x128xf32> to vector<256x128xbf16>
    %c7 = arith.constant 7 : index
    %c0_48 = arith.constant 0 : index
    %c0_49 = arith.constant 0 : index
    %58 = vector.load %arg3[%c7, %c0_48, %c0_49] : memref<9x128x128xbf16, #tpu.memory_space<vmem>>, vector<1x128x128xbf16>
    %59 = vector.shape_cast %58 : vector<1x128x128xbf16> to vector<128x128xbf16>
    %cst_50 = arith.constant dense<0.000000e+00> : vector<256x128xf32>
    %60 = tpu.matmul %57, %59, %cst_50 {dimension_numbers = #tpu.dot_dimension_numbers<[1], [0], [0], [1], [0, 0, 1, 1], [], []>} : vector<256x128xbf16>, vector<128x128xbf16>, vector<256x128xf32> -> vector<256x128xf32>
    %61 = arith.addf %54, %60 : vector<256x128xf32>
    %c2_51 = arith.constant 2 : index
    %c2_52 = arith.constant 2 : index
    %c0_53 = arith.constant 0 : index
    %62 = vector.load %arg6[%c2_51, %c2_52, %c0_53] : memref<18x18x128xf32, #tpu.memory_space<vmem>>, vector<16x16x128xf32>
    %63 = vector.shape_cast %62 : vector<16x16x128xf32> to vector<256x128xf32>
    %64 = arith.truncf %63 : vector<256x128xf32> to vector<256x128xbf16>
    %c8 = arith.constant 8 : index
    %c0_54 = arith.constant 0 : index
    %c0_55 = arith.constant 0 : index
    %65 = vector.load %arg3[%c8, %c0_54, %c0_55] : memref<9x128x128xbf16, #tpu.memory_space<vmem>>, vector<1x128x128xbf16>
    %66 = vector.shape_cast %65 : vector<1x128x128xbf16> to vector<128x128xbf16>
    %cst_56 = arith.constant dense<0.000000e+00> : vector<256x128xf32>
    %67 = tpu.matmul %64, %66, %cst_56 {dimension_numbers = #tpu.dot_dimension_numbers<[1], [0], [0], [1], [0, 0, 1, 1], [], []>} : vector<256x128xbf16>, vector<128x128xbf16>, vector<256x128xf32> -> vector<256x128xf32>
    %68 = arith.addf %61, %67 : vector<256x128xf32>
    %c0_57 = arith.constant 0 : index
    %c0_58 = arith.constant 0 : index
    %69 = vector.load %arg4[%c0_57, %c0_58] : memref<256x128xf32, #tpu.memory_space<vmem>>, vector<256x128xf32>
    tpu.vector_store %arg4[%c0_57, %c0_58], %68 {strides = array<i32>} : memref<256x128xf32, #tpu.memory_space<vmem>>, vector<256x128xf32>,
    %cst_59 = arith.constant dense<0.000000e+00> : vector<128xf32>
    %70 = vector.multi_reduction <add>, %68, %cst_59 [0] : vector<256x128xf32> to vector<128xf32>
    %71 = vector.shape_cast %70 : vector<128xf32> to vector<1x128xf32>
    %72 = arith.mulf %68, %68 : vector<256x128xf32>
    %cst_60 = arith.constant dense<0.000000e+00> : vector<128xf32>
    %73 = vector.multi_reduction <add>, %72, %cst_60 [0] : vector<256x128xf32> to vector<128xf32>
    %74 = vector.shape_cast %73 : vector<128xf32> to vector<1x128xf32>
    %cst_61 = arith.constant 0.000000e+00 : f32
    %75 = vector.broadcast %cst_61 : f32 to vector<6x128xf32>
    %76 = tpu.concatenate %71, %74, %75 in 0 : vector<1x128xf32>, vector<1x128xf32>, vector<6x128xf32> -> vector<8x128xf32>
    %77 = vector.shape_cast %76 : vector<8x128xf32> to vector<1x8x128xf32>
    %c0_62 = arith.constant 0 : index
    %c0_63 = arith.constant 0 : index
    %c0_64 = arith.constant 0 : index
    %78 = vector.load %arg5[%c0_62, %c0_63, %c0_64] : memref<1x8x128xf32, #tpu.memory_space<vmem>>, vector<1x8x128xf32>
    tpu.vector_store %arg5[%c0_62, %c0_63, %c0_64], %77 {strides = array<i32>} : memref<1x8x128xf32, #tpu.memory_space<vmem>>, vector<1x8x128xf32>,
    return
  }
  func.func @transform_1(%arg0: i32, %arg1: i32) -> (i32, i32, i32) {
    %c0_i32 = arith.constant 0 : i32
    %c0_i32_0 = arith.constant 0 : i32
    %c0_i32_1 = arith.constant 0 : i32
    %c0_i32_2 = arith.constant 0 : i32
    return %c0_i32, %c0_i32_0, %c0_i32_1 : i32, i32, i32
  }
  func.func @transform_2(%arg0: i32, %arg1: i32) -> (i32, i32) {
    %c1_i32 = arith.constant 1 : i32
    %0 = arith.muli %arg0, %c1_i32 : i32
    %1 = arith.addi %0, %arg1 : i32
    %c0_i32 = arith.constant 0 : i32
    %c0_i32_0 = arith.constant 0 : i32
    return %1, %c0_i32 : i32, i32
  }
  func.func @transform_3(%arg0: i32, %arg1: i32) -> (i32, i32, i32) {
    %c1_i32 = arith.constant 1 : i32
    %0 = arith.muli %arg0, %c1_i32 : i32
    %1 = arith.addi %0, %arg1 : i32
    %c0_i32 = arith.constant 0 : i32
    %c0_i32_0 = arith.constant 0 : i32
    %c0_i32_1 = arith.constant 0 : i32
    return %1, %c0_i32, %c0_i32_0 : i32, i32, i32
  }
}

</mosaic_0001>

<bundles_post_ra>
// kernel: tpu_custom_call.1
= control target key start
LH: loop header
LB: loop body
LE: loop exit
PB: predicated region body
PF: predicated region fallthrough
CT: control target
= control target key end

     0   :  { %9 = vsyncpa [#allocation5], 0  ;;  %s5458_s0 = inlined_call_operand.vmem [shape: f32[2,18,18,128], index: 0, kind: input, shape index: {}]   ;;  %s5459_s1 = inlined_call_operand.vmem [shape: bf16[9,128,128], index: 1, kind: input, shape index: {}]   ;;  %s5460_s2 = inlined_call_operand.hbm [shape: f32[512,128], index: 2, kind: output, shape index: {0}]   ;;  %s5461_s3 = inlined_call_operand.hbm [shape: f32[2,8,128], index: 3, kind: output, shape index: {1}]  }
   0x1   :  { %11 = vsyncpa [#allocation5 + $0x1], 0 }
   0x2   :  { %12 = vsyncpa [#allocation7], 0 }
   0x3   :  { %14 = vsyncpa [#allocation7 + $0x1], 0  ;;  %s4772_s12 = smov 0   ;;  %s4774_s13 = smov 0  }
   0x4   :  { %s4776_s14 = smov 0   ;;  %s4778_s15 = smov 0  }
   0x5   :  { %s4780_s16 = smov 0   ;;  %s4782_s17 = smov 0  }
   0x6 LB: > { %s3339_s18 = sadd.s32 4294967295, %s4746_s17   ;;  %s3340_s19 = sadd.s32 4294967294, %s4746_s17   ;;  %s4746_s17 = sphi %s4782_s17, %s20_s17   ;;  %s4742_s16 = sphi %s4780_s16, %s5468_s16   ;;  %s4738_s15 = sphi %s4778_s15, %s5467_s15   ;;  %s4734_s14 = sphi %s4776_s14, %s5466_s14   ;;  %s4730_s13 = sphi %s4774_s13, %s5465_s13   ;;  %s4726_s12 = sphi %s4772_s12, %s5464_s12  }
   0x7   : > { %s32_s20 = sadd.s32 1, %s4742_s16  ;;  %s62_s21 = sadd.s32 1, %s4734_s14 }
   0x8   : > { %p34_p0 = scmp.ge.s32.totalorder %s32_s20, 2  ;;  %p72_p1 = scmp.ne.s32.totalorder %s4734_s14, %s4730_s13 }
   0x9   : > { %p73_p2 = scmp.eq.s32.totalorder %s3339_s18, 1  ;;  %p78_p3 = scmp.ne.s32.totalorder %s4730_s13, %s4726_s12 }
   0xa   : > { %s5470_s20 = smov (%p34_p0, %s32_s20), 0  ;;  %p79_p5 = scmp.eq.s32.totalorder %s3340_s19, 1 }
   0xb   : > { %p4812_p4 = por %p73_p2, %p72_p1  ;;  %s59_s23 = ssub.s32 %s4742_s16, %s5470_s20 }
   0xc   : > { %p3342_p6 = scmp.ge.s32.totalorder %s4746_s17, 1  ;;  %p60_p7 = scmp.eq.s32.totalorder %s59_s23, 0 }
   0xd   : > { %p4819_p8 = por %p79_p5, %p78_p3  ;;  %p128_p9 = scmp.lt.s32.totalorder %s4746_s17, 3 }
   0xe   : > { %s4825_s25 = scalar_select %p60_p7, %s4734_s14, %s62_s21  }
   0xf   : > { %p129_p10 = pnand %p3342_p6, %p128_p9 }
  0x10   : > { %s4828_s26 = sand.u32 (!%p129_p10), 1, %s4730_s13   ;;  %s156_s27 = smul.u32 (!%p129_p10), 432, %s4738_s15 }
  0x11   : > { %132 = sbr.rel (%p129_p10) target bundleno = 630 (0x276), region = 24  ;;  %s3343_s28 = sshll.u32 (!%p129_p10), %s4828_s26, 8 }
  0x12   : > { %s3344_s29 = sshll.u32 (!%p129_p10), %s4828_s26, 3  ;;  %s4836_s5 = scalar_lea.vmem (!%p129_p10), %s5458_s0, %s156_s27 }
  0x13   : > { %v230_v0 = vld [vmem:[%s4836_s5] sm:$0xff] (!%p129_p10)  ;;  %v232_v1 = vld [vmem:[%s4836_s5 + $0x8] sm:$0xff] (!%p129_p10)  ;;  %v234_v2 = vld [vmem:[%s4836_s5 + $0x18] sm:$0xff] (!%p129_p10)  ;;  %s4894_s6 = scalar_lea.vmem (!%p129_p10), [#allocation4], %s3343_s28  ;;  %s4898_s7 = scalar_lea.vmem (!%p129_p10), [#allocation6], %s3344_s29 }
  0x14   : > { %231 = vst [vmem:[#allocation2] sm:$0xff] (!%p129_p10), %v230_v0  ;;  %233 = vst [vmem:[#allocation2 + $0x8] sm:$0xff] (!%p129_p10), %v232_v1  ;;  %v236_v3 = vld [vmem:[%s4836_s5 + $0x20] sm:$0xff] (!%p129_p10)  ;;  %v238_v4 = vld [vmem:[%s4836_s5 + $0x30] sm:$0xff] (!%p129_p10) }
  0x15   : > { %235 = vst [vmem:[#allocation2 + $0x18] sm:$0xff] (!%p129_p10), %v234_v2  ;;  %v240_v5 = vld [vmem:[%s4836_s5 + $0x38] sm:$0xff] (!%p129_p10)  ;;  %237 = vst [vmem:[#allocation2 + $0x20] sm:$0xff] (!%p129_p10), %v236_v3  ;;  %v242_v6 = vld [vmem:[%s4836_s5 + $0x48] sm:$0xff] (!%p129_p10) }
  0x16   : > { %239 = vst [vmem:[#allocation2 + $0x30] sm:$0xff] (!%p129_p10), %v238_v4  ;;  %241 = vst [vmem:[#allocation2 + $0x38] sm:$0xff] (!%p129_p10), %v240_v5  ;;  %v244_v7 = vld [vmem:[%s4836_s5 + $0x50] sm:$0xff] (!%p129_p10)  ;;  %v246_v8 = vld [vmem:[%s4836_s5 + $0x60] sm:$0xff] (!%p129_p10) }
  0x17   : > { %243 = vst [vmem:[#allocation2 + $0x48] sm:$0xff] (!%p129_p10), %v242_v6  ;;  %245 = vst [vmem:[#allocation2 + $0x50] sm:$0xff] (!%p129_p10), %v244_v7  ;;  %v248_v9 = vld [vmem:[%s4836_s5 + $0x68] sm:$0xff] (!%p129_p10)  ;;  %v250_v10 = vld [vmem:[%s4836_s5 + $0x78] sm:$0xff] (!%p129_p10) }
  0x18   : > { %247 = vst [vmem:[#allocation2 + $0x60] sm:$0xff] %v246_v8  ;;  %v252_v11 = vld [vmem:[%s4836_s5 + $0x80] sm:$0xff]  ;;  %249 = vst [vmem:[#allocation2 + $0x68] sm:$0xff] %v248_v9  ;;  %v254_v12 = vld [vmem:[%s4836_s5 + $0x90] sm:$0xff] }
  0x19   : > { %251 = vst [vmem:[#allocation2 + $0x78] sm:$0xff] %v250_v10  ;;  %253 = vst [vmem:[#allocation2 + $0x80] sm:$0xff] %v252_v11  ;;  %v256_v13 = vld [vmem:[%s4836_s5 + $0x98] sm:$0xff]  ;;  %v258_v14 = vld [vmem:[%s4836_s5 + $0xa8] sm:$0xff] }
  0x1a   : > { %255 = vst [vmem:[#allocation2 + $0x90] sm:$0xff] %v254_v12  ;;  %257 = vst [vmem:[#allocation2 + $0x98] sm:$0xff] %v256_v13  ;;  %v260_v15 = vld [vmem:[%s4836_s5 + $0xb0] sm:$0xff]  ;;  %v262_v16 = vld [vmem:[%s4836_s5 + $0xc0] sm:$0xff] }
  0x1b   : > { %259 = vst [vmem:[#allocation2 + $0xa8] sm:$0xff] %v258_v14  ;;  %v264_v17 = vld [vmem:[%s4836_s5 + $0xc8] sm:$0xff]  ;;  %261 = vst [vmem:[#allocation2 + $0xb0] sm:$0xff] %v260_v15  ;;  %v266_v18 = vld [vmem:[%s4836_s5 + $0xd8] sm:$0xff] }
  0x1c   : > { %263 = vst [vmem:[#allocation2 + $0xc0] sm:$0xff] %v262_v16  ;;  %265 = vst [vmem:[#allocation2 + $0xc8] sm:$0xff] %v264_v17  ;;  %v268_v19 = vld [vmem:[%s4836_s5 + $0xe0] sm:$0xff]  ;;  %v270_v20 = vld [vmem:[%s4836_s5 + $0xf0] sm:$0xff] }
  0x1d   : > { %267 = vst [vmem:[#allocation2 + $0xd8] sm:$0xff] %v266_v18  ;;  %269 = vst [vmem:[#allocation2 + $0xe0] sm:$0xff] %v268_v19  ;;  %v272_v21 = vld [vmem:[%s4836_s5 + $0xf8] sm:$0xff]  ;;  %v274_v22 = vld [vmem:[%s4836_s5 + $0x108] sm:$0xff] }
  0x1e   : > { %271 = vst [vmem:[#allocation2 + $0xf0] sm:$0xff] %v270_v20  ;;  %v276_v23 = vld [vmem:[%s4836_s5 + $0x110] sm:$0xff]  ;;  %273 = vst [vmem:[#allocation2 + $0xf8] sm:$0xff] %v272_v21  ;;  %v278_v24 = vld [vmem:[%s4836_s5 + $0x120] sm:$0xff] }
  0x1f   : > { %275 = vst [vmem:[#allocation2 + $0x108] sm:$0xff] %v274_v22  ;;  %277 = vst [vmem:[#allocation2 + $0x110] sm:$0xff] %v276_v23  ;;  %v280_v25 = vld [vmem:[%s4836_s5 + $0x128] sm:$0xff]  ;;  %v282_v26 = vld [vmem:[%s4836_s5 + $0x138] sm:$0xff] }
  0x20   : > { %279 = vst [vmem:[#allocation2 + $0x120] sm:$0xff] %v278_v24  ;;  %281 = vst [vmem:[#allocation2 + $0x128] sm:$0xff] %v280_v25  ;;  %v284_v27 = vld [vmem:[%s4836_s5 + $0x140] sm:$0xff]  ;;  %v286_v28 = vld [vmem:[%s4836_s5 + $0x150] sm:$0xff] }
  0x21   : > { %283 = vst [vmem:[#allocation2 + $0x138] sm:$0xff] %v282_v26  ;;  %v288_v29 = vld [vmem:[%s4836_s5 + $0x158] sm:$0xff]  ;;  %285 = vst [vmem:[#allocation2 + $0x140] sm:$0xff] %v284_v27  ;;  %v290_v30 = vld [vmem:[%s4836_s5 + $0x168] sm:$0xff] }
  0x22   : > { %287 = vst [vmem:[#allocation2 + $0x150] sm:$0xff] %v286_v28  ;;  %289 = vst [vmem:[#allocation2 + $0x158] sm:$0xff] %v288_v29  ;;  %v292_v31 = vld [vmem:[%s4836_s5 + $0x170] sm:$0xff]  ;;  %v294_v32 = vld [vmem:[%s4836_s5 + $0x180] sm:$0xff] }
  0x23   : > { %291 = vst [vmem:[#allocation2 + $0x168] sm:$0xff] %v290_v30  ;;  %293 = vst [vmem:[#allocation2 + $0x170] sm:$0xff] %v292_v31  ;;  %v296_v33 = vld [vmem:[%s4836_s5 + $0x188] sm:$0xff]  ;;  %v298_v34 = vld [vmem:[%s4836_s5 + $0x198] sm:$0xff] }
  0x24   : > { %295 = vst [vmem:[#allocation2 + $0x180] sm:$0xff] %v294_v32  ;;  %v300_v35 = vld [vmem:[%s4836_s5 + $0x1a0] sm:$0xff]  ;;  %297 = vst [vmem:[#allocation2 + $0x188] sm:$0xff] %v296_v33  ;;  %v3345_v36 = vld [vmem:[%s4836_s5 + $0x10] sm:$0x3] }
  0x25   : > { %299 = vst [vmem:[#allocation2 + $0x198] sm:$0xff] %v298_v34  ;;  %301 = vst [vmem:[#allocation2 + $0x1a0] sm:$0xff] %v300_v35  ;;  %v3346_v37 = vld [vmem:[%s4836_s5 + $0x28] sm:$0x3]  ;;  %v3347_v38 = vld [vmem:[%s4836_s5 + $0x40] sm:$0x3] }
  0x26   : > { %312 = vst [vmem:[#allocation2 + $0x10] sm:$0x3] %v3345_v36  ;;  %314 = vst [vmem:[#allocation2 + $0x28] sm:$0x3] %v3346_v37  ;;  %v3348_v39 = vld [vmem:[%s4836_s5 + $0x58] sm:$0x3] }
  0x27   : > { %316 = vst [vmem:[#allocation2 + $0x40] sm:$0x3] %v3347_v38  ;;  %v3349_v40 = vld [vmem:[%s4836_s5 + $0x70] sm:$0x3]  ;;  %v3350_v41 = vld [vmem:[%s4836_s5 + $0x88] sm:$0x3] }
  0x28   : > { %318 = vst [vmem:[#allocation2 + $0x58] sm:$0x3] %v3348_v39  ;;  %320 = vst [vmem:[#allocation2 + $0x70] sm:$0x3] %v3349_v40  ;;  %v3351_v42 = vld [vmem:[%s4836_s5 + $0xa0] sm:$0x3] }
  0x29   : > { %322 = vst [vmem:[#allocation2 + $0x88] sm:$0x3] %v3350_v41  ;;  %v3352_v43 = vld [vmem:[%s4836_s5 + $0xb8] sm:$0x3]  ;;  %v3353_v44 = vld [vmem:[%s4836_s5 + $0xd0] sm:$0x3] }
  0x2a   : > { %324 = vst [vmem:[#allocation2 + $0xa0] sm:$0x3] %v3351_v42  ;;  %326 = vst [vmem:[#allocation2 + $0xb8] sm:$0x3] %v3352_v43  ;;  %v3354_v45 = vld [vmem:[%s4836_s5 + $0xe8] sm:$0x3] }
  0x2b   : > { %328 = vst [vmem:[#allocation2 + $0xd0] sm:$0x3] %v3353_v44  ;;  %v3355_v46 = vld [vmem:[%s4836_s5 + $0x100] sm:$0x3]  ;;  %v3356_v47 = vld [vmem:[%s4836_s5 + $0x118] sm:$0x3] }
  0x2c   : > { %330 = vst [vmem:[#allocation2 + $0xe8] sm:$0x3] %v3354_v45  ;;  %332 = vst [vmem:[#allocation2 + $0x100] sm:$0x3] %v3355_v46  ;;  %v3357_v48 = vld [vmem:[%s4836_s5 + $0x130] sm:$0x3] }
  0x2d   : > { %334 = vst [vmem:[#allocation2 + $0x118] sm:$0x3] %v3356_v47  ;;  %v3358_v49 = vld [vmem:[%s4836_s5 + $0x148] sm:$0x3]  ;;  %v3359_v50 = vld [vmem:[%s4836_s5 + $0x160] sm:$0x3] }
  0x2e   : > { %336 = vst [vmem:[#allocation2 + $0x130] sm:$0x3] %v3357_v48  ;;  %338 = vst [vmem:[#allocation2 + $0x148] sm:$0x3] %v3358_v49  ;;  %v3360_v51 = vld [vmem:[%s4836_s5 + $0x178] sm:$0x3] }
  0x2f   : > { %340 = vst [vmem:[#allocation2 + $0x160] sm:$0x3] %v3359_v50  ;;  %v3361_v52 = vld [vmem:[%s4836_s5 + $0x190] sm:$0x3]  ;;  %v3362_v53 = vld [vmem:[%s4836_s5 + $0x1a8] sm:$0x3] }
  0x30   : > { %342 = vst [vmem:[#allocation2 + $0x178] sm:$0x3] %v3360_v51  ;;  %344 = vst [vmem:[#allocation2 + $0x190] sm:$0x3] %v3361_v52 }
  0x31   : > { %346 = vst [vmem:[#allocation2 + $0x1a8] sm:$0x3] %v3362_v53 }
  0x32   : > { %350 = vsyncadd [#allocation3], 5184 }
  0x33   : > { %4714 = dma.done.wait [#allocation3], 5184 }
  0x34   : > { %4715 = vsyncadd [#allocation3], 4294962112  ;;  %v4554_v54 = vld [vmem:[%s5459_s1 + $0x40] sm:$0xff]   ;;  %v4556_v56 = vld [vmem:[%s5459_s1 + $0x48] sm:$0xff]   ;;  %s3571_s21 = sshll.u32 %s4738_s15, 12  ;;  %s3209_s23 = sshll.u32 %s4894_s6, 4  ;;  %s5375_s23 = int_to_ptr.vmem [resolvable:$true] %s3209_s23 }
  0x35   : > { %v4555_v55 = vld [vmem:[%s5459_s1 + $0x100] sm:$0xff]   ;;  %3788 = vmatprep.subr.bf16.mxu1 %v4554_v54  ;;  %v4557_v57 = vld [vmem:[%s5459_s1 + $0x108] sm:$0xff]   ;;  %v4558_v58 = vld [vmem:[%s5459_s1 + $0x50] sm:$0xff]   ;;  %s5373_s29 = scalar_lea.hbm %s5460_s2, %s3571_s21  ;;  %s3190_s30 = scalar_lea.sflag [#allocation5], %s4828_s26 }
  0x36   : > { %3980 = vmatprep.subr.bf16.mxu0 %v4555_v55  ;;  %3789 = vmatpush3.bf16.msra.mxu1 %v4554_v54  ;;  %v4559_v59 = vld [vmem:[%s5459_s1 + $0x110] sm:$0xff]   ;;  %v4560_v60 = vld [vmem:[%s5459_s1 + $0x58] sm:$0xff]   ;;  %v4562_v62 = vld [vmem:[%s5459_s1 + $0x60] sm:$0xff]   ;;  %s4634_s4 = scalar_lea.vmem %s5375_s23, 4096  ;;  %s4748_s5 = smov [#allocation4]  }
  0x37   : > { %3981 = vmatpush3.bf16.msra.mxu0 %v4555_v55  ;;  %3790 = vmatprep.subr.bf16.mxu1 %v4556_v56  ;;  %v4561_v61 = vld [vmem:[%s5459_s1 + $0x118] sm:$0xff]   ;;  %v4563_v63 = vld [vmem:[%s5459_s1 + $0x120] sm:$0xff]   ;;  %v4564_v0 = vld [vmem:[%s5459_s1 + $0x68] sm:$0xff]   ;;  %p4635_p11 = scmp.ne.s32.totalorder %s5375_s23, %s4634_s4  ;;  %s4638_s8 = sshll.u32 %s4748_s5, 4  ;;  %s4639_s8 = int_to_ptr.vmem [resolvable:$false] %s4638_s8 }
  0x38   : > { %3982 = vmatprep.subr.bf16.mxu0 %v4557_v57  ;;  %v4565_v1 = vld [vmem:[%s5459_s1 + $0x128] sm:$0xff]   ;;  %v1515_v4 = vld [vmem:[#allocation2 + $0x19] sm:$0xff]  ;;  %v4566_v8 = vld [vmem:[%s5459_s1 + $0x70] sm:$0xff]   ;;  %s4640_s9 = scalar_lea.vmem %s4639_s8, 8192  ;;  %p4641_p0 = scmp.lt.s32.totalorder %s5375_s23, %s4639_s8 }
  0x39   : > { %v419_v2 = vld [vmem:[#allocation2 + $0x1] sm:$0xff]  ;;  %v420_v3 = vld [vmem:[#allocation2 + $0x9] sm:$0xff]  ;;  %v4568_v10 = vld [vmem:[%s5459_s1 + $0x78] sm:$0xff]   ;;  %p4636_p12 = pnand %p4635_p11, %p4812_p4  ;;  %p4642_p1 = scmp.lt.s32.totalorder %s4640_s9, %s4634_s4 }
  0x3a   : > { %3791 = vmatpush3.bf16.msra.mxu1 %v4556_v56  ;;  %v451_v5 = vpack.c.bf16 %v420_v3, %v419_v2  ;;  %v1516_v6 = vld [vmem:[#allocation2 + $0x21] sm:$0xff]  ;;  %v4567_v9 = vld [vmem:[%s5459_s1 + $0x130] sm:$0xff]   ;;  %v4569_v11 = vld [vmem:[%s5459_s1 + $0x138] sm:$0xff]  }
  0x3b   : > { %3983 = vmatpush3.bf16.msra.mxu0 %v4557_v57  ;;  %3792 = vmatprep.subr.bf16.mxu1 %v4558_v58  ;;  %v1547_v7 = vpack.c.bf16 %v1516_v6, %v1515_v4  ;;  %v4570_v12 = vld [vmem:[%s5459_s1] sm:$0xff]   ;;  %v1517_v13 = vld [vmem:[#allocation2 + $0x31] sm:$0xff]  ;;  %v1519_v16 = vld [vmem:[#allocation2 + $0x49] sm:$0xff]  ;;  %p4637_p13 = pneg %p4636_p12  ;;  %p4643_p2 = por %p4642_p1, %p4641_p0 }
  0x3c   : > { %3984 = vmatprep.subr.bf16.mxu0 %v4559_v59  ;;  %3804 = vmatprep.mubr.bf16.mxu1 %v451_v5  ;;  %v1518_v14 = vld [vmem:[#allocation2 + $0x39] sm:$0xff]  ;;  %v1520_v17 = vld [vmem:[#allocation2 + $0x51] sm:$0xff]  ;;  %v4572_v19 = vld [vmem:[%s5459_s1 + $0x148] sm:$0xff]  }
  0x3d   : > { %3996 = vmatprep.mubr.bf16.mxu0 %v1547_v7  ;;  %v4571_v15 = vld [vmem:[%s5459_s1 + $0x140] sm:$0xff]   ;;  %v1548_v18 = vpack.c.bf16 %v1518_v14, %v1517_v13  ;;  %v1549_v20 = vpack.c.bf16 %v1520_v17, %v1519_v16  ;;  %v4573_v21 = vld [vmem:[%s5459_s1 + $0x8] sm:$0xff]   ;;  %v4574_v24 = vld [vmem:[%s5459_s1 + $0x150] sm:$0xff]   ;;  %p4644_p3 = pnand %p4643_p2, %p4637_p13 }
  0x3e   : > { %3793 = vmatpush3.bf16.msra.mxu1 %v4558_v58  ;;  %v1521_v22 = vld [vmem:[#allocation2 + $0x61] sm:$0xff]  ;;  %v1522_v23 = vld [vmem:[#allocation2 + $0x69] sm:$0xff]  ;;  %v1523_v25 = vld [vmem:[#allocation2 + $0x79] sm:$0xff] }
  0x3f   : > { %3985 = vmatpush3.bf16.msra.mxu0 %v4559_v59  ;;  %3794 = vmatprep.subr.bf16.mxu1 %v4560_v60  ;;  %v4576_v26 = vld [vmem:[%s5459_s1 + $0x10] sm:$0xff]   ;;  %v1524_v27 = vld [vmem:[#allocation2 + $0x81] sm:$0xff]  ;;  %v1550_v28 = vpack.c.bf16 %v1522_v23, %v1521_v22  ;;  %v4575_v30 = vld [vmem:[%s5459_s1 + $0x158] sm:$0xff]  }
  0x40   : > { %3986 = vmatprep.subr.bf16.mxu0 %v4561_v61  ;;  %v1551_v29 = vpack.c.bf16 %v1524_v27, %v1523_v25  ;;  %v4579_v31 = vld [vmem:[%s5459_s1 + $0x18] sm:$0xff]   ;;  %v4577_v34 = vld [vmem:[%s5459_s1 + $0x160] sm:$0xff]   ;;  %v1527_v35 = vld [vmem:[#allocation2 + $0xa9] sm:$0xff] }
  0x41   : > { %v1525_v32 = vld [vmem:[#allocation2 + $0x91] sm:$0xff]  ;;  %v1526_v33 = vld [vmem:[#allocation2 + $0x99] sm:$0xff]  ;;  %v4578_v40 = vld [vmem:[%s5459_s1 + $0x168] sm:$0xff]  }
  0x42   : > { %3795 = vmatpush3.bf16.msra.mxu1 %v4560_v60  ;;  %v1528_v36 = vld [vmem:[#allocation2 + $0xb1] sm:$0xff]  ;;  %v4582_v37 = vld [vmem:[%s5459_s1 + $0x20] sm:$0xff]   ;;  %v1552_v38 = vpack.c.bf16 %v1526_v33, %v1525_v32  ;;  %v4584_v41 = vld [vmem:[%s5459_s1 + $0x28] sm:$0xff]  }
  0x43   : > { %3987 = vmatpush3.bf16.msra.mxu0 %v4561_v61  ;;  %3796 = vmatprep.subr.bf16.mxu1 %v4562_v62  ;;  %v4978_v39 = vpack.c.bf16 %v1528_v36, %v1527_v35  ;;  %v1529_v42 = vld [vmem:[#allocation2 + $0xc1] sm:$0xff]  ;;  %v1530_v43 = vld [vmem:[#allocation2 + $0xc9] sm:$0xff]  ;;  %v4581_v50 = vld [vmem:[%s5459_s1 + $0x178] sm:$0xff]  }
  0x44   : > { %3988 = vmatprep.subr.bf16.mxu0 %v4563_v63  ;;  %v4580_v44 = vld [vmem:[%s5459_s1 + $0x170] sm:$0xff]   ;;  %v1821_v45 = vld [vmem:[#allocation2 + $0x1a] sm:$0xff]  ;;  %v1822_v46 = vld [vmem:[#allocation2 + $0x22] sm:$0xff]  ;;  %v1554_v48 = vpack.c.bf16 %v1530_v43, %v1529_v42 }
  0x45   : > { %v4586_v47 = vld [vmem:[%s5459_s1 + $0x30] sm:$0xff]   ;;  %v4993_v49 = vpack.c.bf16 %v1822_v46, %v1821_v45  ;;  %v437_v51 = vld [vmem:[#allocation2 + $0xd9] sm:$0xff]  ;;  %v438_v52 = vld [vmem:[#allocation2 + $0xe1] sm:$0xff] }
  0x46   : > { %3797 = vmatpush3.bf16.msra.mxu1 %v4562_v62  ;;  %v1823_v53 = vld [vmem:[#allocation2 + $0x32] sm:$0xff]  ;;  %v1824_v55 = vld [vmem:[#allocation2 + $0x3a] sm:$0xff]  ;;  %v1825_v59 = vld [vmem:[#allocation2 + $0x4a] sm:$0xff]  ;;  %v5006_v61 = vpack.c.bf16 %v438_v52, %v437_v51 }
  0x47   : > { %3989 = vmatpush3.bf16.msra.mxu0 %v4563_v63  ;;  %3798 = vmatprep.subr.bf16.mxu1 %v4564_v0  ;;  %v4588_v54 = vld [vmem:[%s5459_s1 + $0x38] sm:$0xff]   ;;  %v4583_v58 = vld [vmem:[%s5459_s1 + $0x180] sm:$0xff]   ;;  %v5013_v63 = vpack.c.bf16 %v1824_v55, %v1823_v53  ;;  %v4585_v2 = vld [vmem:[%s5459_s1 + $0x188] sm:$0xff]  }
  0x48   : > { %3990 = vmatprep.subr.bf16.mxu0 %v4565_v1  ;;  %v439_v56 = vld [vmem:[#allocation2 + $0xf1] sm:$0xff]  ;;  %v440_v57 = vld [vmem:[#allocation2 + $0xf9] sm:$0xff]  ;;  %v441_v3 = vld [vmem:[#allocation2 + $0x109] sm:$0xff] }
  0x49   : > { %v1826_v60 = vld [vmem:[#allocation2 + $0x52] sm:$0xff]  ;;  %v5011_v62 = vld [vmem:[%s5459_s1 + $0x80] sm:$0xff]   ;;  %v1828_v6 = vld [vmem:[#allocation2 + $0x6a] sm:$0xff] }
  0x4a   : > { %3799 = vmatpush3.bf16.msra.mxu1 %v4564_v0  ;;  %v5015_v0 = vpack.c.bf16 %v440_v57, %v439_v56  ;;  %v442_v4 = vld [vmem:[#allocation2 + $0x111] sm:$0xff]  ;;  %v1827_v5 = vld [vmem:[#allocation2 + $0x62] sm:$0xff]  ;;  %v445_v16 = vld [vmem:[#allocation2 + $0x139] sm:$0xff] }
  0x4b   : > { %3991 = vmatpush3.bf16.msra.mxu0 %v4565_v1  ;;  %3800 = vmatprep.subr.bf16.mxu1 %v4566_v8  ;;  %v5017_v1 = vpack.c.bf16 %v1826_v60, %v1825_v59  ;;  %v5032_v13 = vpack.c.bf16 %v1828_v6, %v1827_v5  ;;  %v4589_v17 = vld [vmem:[%s5459_s1 + $0x198] sm:$0xff]   ;;  %v1833_v23 = vld [vmem:[#allocation2 + $0xaa] sm:$0xff]  ;;  %v4591_v25 = vld [vmem:[%s5459_s1 + $0x1a0] sm:$0xff]  }
  0x4c   : > { %3992 = vmatprep.subr.bf16.mxu0 %v4567_v9  ;;  %v448_v22 = vld [vmem:[#allocation2 + $0x159] sm:$0xff]  ;;  %v4593_v32 = vld [vmem:[%s5459_s1 + $0x1a8] sm:$0xff]   ;;  %v359_v51 = vld [vmem:[#allocation2 + $0x30] sm:$0xff] }
  0x4d   : > { %v1835_v33 = vld [vmem:[#allocation2 + $0xc2] sm:$0xff]  ;;  %v357_v45 = vld [vmem:[#allocation2 + $0x18] sm:$0xff]  ;;  %v1841_v53 = vld [vmem:[#allocation2 + $0x10a] sm:$0xff] }
  0x4e   : > { %3801 = vmatpush3.bf16.msra.mxu1 %v4566_v8  ;;  %v444_v8 = vld [vmem:[#allocation2 + $0x129] sm:$0xff]  ;;  %v355_v35 = vld [vmem:[#allocation2] sm:$0xff]  ;;  %v360_v52 = vld [vmem:[#allocation2 + $0x38] sm:$0xff] }
  0x4f   : > { %3993 = vmatpush3.bf16.msra.mxu0 %v4567_v9  ;;  %3802 = vmatprep.subr.bf16.mxu1 %v4568_v10  ;;  %v1829_v9 = vld [vmem:[#allocation2 + $0x7a] sm:$0xff]  ;;  %v356_v36 = vld [vmem:[#allocation2 + $0x8] sm:$0xff] }
  0x50   : > { %3994 = vmatprep.subr.bf16.mxu0 %v4569_v11  ;;  %v387_v43 = vpack.c.bf16 %v356_v36, %v355_v35  ;;  %v358_v46 = vld [vmem:[#allocation2 + $0x20] sm:$0xff]  ;;  %v361_v60 = vld [vmem:[#allocation2 + $0x48] sm:$0xff] }
  0x51   : > { %v5081_v55 = vld [vmem:[%s5459_s1 + $0x1c0] sm:$0xff]   ;;  %v5083_v56 = vpack.c.bf16 %v358_v46, %v357_v45  ;;  %v1844_v5 = vld [vmem:[#allocation2 + $0x12a] sm:$0xff] }
  0x52   : > { %3803 = vmatpush3.bf16.msra.mxu1 %v4568_v10  ;;  %v1830_v10 = vld [vmem:[#allocation2 + $0x82] sm:$0xff] }
  0x53   : > { %3995 = vmatpush3.bf16.msra.mxu0 %v4569_v11  ;;  %3836 = vmatprep.subr.bf16.mxu1 %v4570_v12  ;;  %v4587_v11 = vld [vmem:[%s5459_s1 + $0x190] sm:$0xff]   ;;  %v363_v6 = vld [vmem:[#allocation2 + $0x60] sm:$0xff]  ;;  %v4600_v36 = vld [vmem:[%s5459_s1 + $0xa8] sm:$0xff]  }
  0x54   : > { %4028 = vmatprep.subr.bf16.mxu0 %v4571_v15  ;;  %v371_v45 = vld [vmem:[#allocation2 + $0xc0] sm:$0xff]  ;;  %v372_v46 = vld [vmem:[#allocation2 + $0xc8] sm:$0xff] }
  0x55   : > { %3805 = vmatmul.mubr.bf16.vlgmr.msra.gmra.mrb[0].mxu1 %v1547_v7  ;;  %v443_v7 = vld [vmem:[#allocation2 + $0x121] sm:$0xff] }
  0x56   : > { %3997 = vmatmul.mubr.bf16.vlgmr.msra.gmra.mrb[0].mxu0 %v1548_v18  ;;  %3837 = vmatpush3.bf16.msra.mxu1 %v4570_v12  ;;  %v5030_v12 = vpack.c.bf16 %v442_v4, %v441_v3  ;;  %v5034_v14 = vpack.c.bf16 %v444_v8, %v443_v7  ;;  %v4592_v3 = vld [vmem:[%s5459_s1 + $0x88] sm:$0xff]   ;;  %v1845_v8 = vld [vmem:[#allocation2 + $0x13a] sm:$0xff] }
  0x57   : > { %4029 = vmatpush3.bf16.msra.mxu0 %v4571_v15  ;;  %3808 = vmatprep.mubr.bf16.mxu1 %v1548_v18  ;;  %v5036_v15 = vpack.c.bf16 %v1830_v10, %v1829_v9  ;;  %v446_v18 = vld [vmem:[#allocation2 + $0x141] sm:$0xff]  ;;  %v4594_v9 = vld [vmem:[%s5459_s1 + $0x90] sm:$0xff]  }
  0x58   : > { %4030 = vmatprep.subr.bf16.mxu0 %v4572_v19  ;;  %4000 = vmatprep.mubr.bf16.mxu0 %v1549_v20  ;;  %v1843_v4 = vld [vmem:[#allocation2 + $0x122] sm:$0xff] }
  0x59   : > { %3838 = vmatprep.subr.bf16.mxu1 %v4573_v21  ;;  %v364_v7 = vld [vmem:[#allocation2 + $0x68] sm:$0xff] }
  0x5a   : > { %3839 = vmatpush3.bf16.msra.mxu1 %v4573_v21  ;;  %v447_v21 = vld [vmem:[#allocation2 + $0x151] sm:$0xff]  ;;  %v1846_v10 = vld [vmem:[#allocation2 + $0x142] sm:$0xff] }
  0x5b   : > { %4031 = vmatpush3.bf16.msra.mxu0 %v4572_v19  ;;  %3840 = vmatprep.subr.bf16.mxu1 %v4576_v26  ;;  %v1831_v19 = vld [vmem:[#allocation2 + $0x92] sm:$0xff] }
  0x5c   : > { %4032 = vmatprep.subr.bf16.mxu0 %v4574_v24 }
  0x5d   : > { %3809 = vmatmul.mubr.bf16.gmra.mrb[4].mxu1 %v1549_v20  ;;  %v1832_v20 = vld [vmem:[#allocation2 + $0x9a] sm:$0xff] }
  0x5e   : > { %4001 = vmatmul.mubr.bf16.gmra.mrb[4].mxu0 %v1550_v28  ;;  %3812 = vmatprep.mubr.bf16.mxu1 %v1550_v28  ;;  %v5050_v27 = vpack.c.bf16 %v1832_v20, %v1831_v19  ;;  %v5052_v28 = vpack.c.bf16 %v448_v22, %v447_v21  ;;  %v366_v19 = vld [vmem:[#allocation2 + $0x80] sm:$0xff]  ;;  %v4596_v20 = vld [vmem:[%s5459_s1 + $0x98] sm:$0xff]  }
  0x5f   : > { %4033 = vmatpush3.bf16.msra.mxu0 %v4574_v24  ;;  %4004 = vmatprep.mubr.bf16.mxu0 %v1551_v29  ;;  %v1834_v24 = vld [vmem:[#allocation2 + $0xb2] sm:$0xff]  ;;  %v1848_v22 = vld [vmem:[#allocation2 + $0x15a] sm:$0xff] }
  0x60   : > { %4034 = vmatprep.subr.bf16.mxu0 %v4575_v30  ;;  %3841 = vmatpush3.bf16.msra.mxu1 %v4576_v26  ;;  %v5048_v26 = vpack.c.bf16 %v446_v18, %v445_v16  ;;  %v5105_v16 = vpack.c.bf16 %v1844_v5, %v1843_v4  ;;  %v365_v18 = vld [vmem:[#allocation2 + $0x78] sm:$0xff] }
  0x61   : > { %3842 = vmatprep.subr.bf16.mxu1 %v4579_v31  ;;  %v1847_v21 = vld [vmem:[#allocation2 + $0x152] sm:$0xff] }
  0x63   : > { %4035 = vmatpush3.bf16.msra.mxu0 %v4575_v30  ;;  %v449_v30 = vld [vmem:[#allocation2 + $0x169] sm:$0xff] }
  0x64   : > { %4036 = vmatprep.subr.bf16.mxu0 %v4577_v34  ;;  %3843 = vmatpush3.bf16.msra.mxu1 %v4579_v31  ;;  %v450_v31 = vld [vmem:[#allocation2 + $0x171] sm:$0xff] }
  0x65   : > { %3813 = vmatmul.mubr.bf16.gmra.mrb[8].mxu1 %v1551_v29  ;;  %3844 = vmatprep.subr.bf16.mxu1 %v4582_v37  ;;  %v5054_v29 = vpack.c.bf16 %v1834_v24, %v1833_v23  ;;  %v367_v23 = vld [vmem:[#allocation2 + $0x90] sm:$0xff]  ;;  %v368_v24 = vld [vmem:[#allocation2 + $0x98] sm:$0xff] }
  0x66   : > { %4005 = vmatmul.mubr.bf16.gmra.mrb[8].mxu0 %v1552_v38  ;;  %3816 = vmatprep.mubr.bf16.mxu1 %v1552_v38  ;;  %v1838_v38 = vld [vmem:[#allocation2 + $0xe2] sm:$0xff] }
  0x67   : > { %4037 = vmatpush3.bf16.msra.mxu0 %v4577_v34  ;;  %4008 = vmatprep.mubr.bf16.mxu0 %v4978_v39  ;;  %v1836_v34 = vld [vmem:[#allocation2 + $0xca] sm:$0xff] }
  0x68   : > { %4038 = vmatprep.subr.bf16.mxu0 %v4578_v40  ;;  %3845 = vmatpush3.bf16.msra.mxu1 %v4582_v37  ;;  %v1837_v37 = vld [vmem:[#allocation2 + $0xda] sm:$0xff]  ;;  %v5068_v42 = vpack.c.bf16 %v1836_v34, %v1835_v33  ;;  %v5123_v33 = vpack.c.bf16 %v1848_v22, %v1847_v21  ;;  %v5125_v34 = vpack.c.bf16 %v368_v24, %v367_v23  ;;  %v383_v23 = vld [vmem:[#allocation2 + $0x150] sm:$0xff] }
  0x69   : > { %3846 = vmatprep.subr.bf16.mxu1 %v4584_v41  ;;  %v4605_v21 = vld [vmem:[%s5459_s1 + $0x1d8] sm:$0xff]   ;;  %v382_v22 = vld [vmem:[#allocation2 + $0x140] sm:$0xff] }
  0x6a   : > { %v384_v24 = vld [vmem:[#allocation2 + $0x158] sm:$0xff] }
  0x6b   : > { %4039 = vmatpush3.bf16.msra.mxu0 %v4578_v40  ;;  %v4595_v40 = vld [vmem:[%s5459_s1 + $0x1b0] sm:$0xff]  }
  0x6c   : > { %4040 = vmatprep.subr.bf16.mxu0 %v4580_v44  ;;  %3847 = vmatpush3.bf16.msra.mxu1 %v4584_v41  ;;  %v5066_v41 = vpack.c.bf16 %v450_v31, %v449_v30  ;;  %v1850_v30 = vld [vmem:[#allocation2 + $0x172] sm:$0xff]  ;;  %v4598_v31 = vld [vmem:[%s5459_s1 + $0xa0] sm:$0xff]  }
  0x6d   : > { %3817 = vmatmul.mubr.bf16.gmra.mrb[12].mxu1 %v4978_v39  ;;  %3848 = vmatprep.subr.bf16.mxu1 %v4586_v47 }
  0x6e   : > { %4009 = vmatmul.mubr.bf16.gmra.mrb[12].mxu0 %v1554_v48  ;;  %3820 = vmatprep.mubr.bf16.mxu1 %v1554_v48  ;;  %v1839_v48 = vld [vmem:[#allocation2 + $0xf2] sm:$0xff] }
  0x6f   : > { %4041 = vmatpush3.bf16.msra.mxu0 %v4580_v44  ;;  %4044 = vmatprep.mubr.bf16.mxu0 %v4993_v49  ;;  %v5070_v44 = vpack.c.bf16 %v1838_v38, %v1837_v37  ;;  %v369_v37 = vld [vmem:[#allocation2 + $0xa8] sm:$0xff]  ;;  %v370_v38 = vld [vmem:[#allocation2 + $0xb0] sm:$0xff] }
  0x70   : > { %4042 = vmatprep.subr.bf16.mxu0 %v4581_v50  ;;  %3849 = vmatpush3.bf16.msra.mxu1 %v4586_v47  ;;  %v4597_v47 = vld [vmem:[%s5459_s1 + $0x1b8] sm:$0xff]  }
  0x71   : > { %3850 = vmatprep.subr.bf16.mxu1 %v4588_v54 }
  0x73   : > { %4043 = vmatpush3.bf16.msra.mxu0 %v4581_v50  ;;  %v1840_v50 = vld [vmem:[#allocation2 + $0xfa] sm:$0xff] }
  0x74   : > { %4076 = vmatprep.subr.bf16.mxu0 %v4583_v58  ;;  %3851 = vmatpush3.bf16.msra.mxu1 %v4588_v54  ;;  %v1842_v54 = vld [vmem:[#allocation2 + $0x112] sm:$0xff]  ;;  %v5085_v57 = vpack.c.bf16 %v1840_v50, %v1839_v48  ;;  %v5139_v48 = vpack.c.bf16 %v370_v38, %v369_v37  ;;  %v385_v37 = vld [vmem:[#allocation2 + $0x168] sm:$0xff] }
  0x75   : > { %3821 = vmatmul.mubr.bf16.gmra.mrb[16].mxu1 %v5006_v61  ;;  %3884 = vmatprep.subr.bf16.mxu1 %v5011_v62  ;;  %v5089_v59 = vpack.c.bf16 %v1842_v54, %v1841_v53  ;;  %v373_v53 = vld [vmem:[#allocation2 + $0xd8] sm:$0xff]  ;;  %v374_v54 = vld [vmem:[#allocation2 + $0xe0] sm:$0xff]  ;;  %v386_v38 = vld [vmem:[#allocation2 + $0x170] sm:$0xff] }
  0x76   : > { %4045 = vmatmul.mubr.bf16.vlgmr.msra.gmra.mrb[0].mxu0 %v5013_v63  ;;  %3824 = vmatprep.mubr.bf16.mxu1 %v5015_v0  ;;  %v5154_v4 = vpack.c.bf16 %v374_v54, %v373_v53  ;;  %v4608_v53 = vld [vmem:[%s5459_s1 + $0xc8] sm:$0xff]   ;;  %v4610_v54 = vld [vmem:[%s5459_s1 + $0xd0] sm:$0xff]  }
  0x77   : > { %4077 = vmatpush3.bf16.msra.mxu0 %v4583_v58  ;;  %4048 = vmatprep.mubr.bf16.mxu0 %v5017_v1  ;;  %v5087_v58 = vpack.c.bf16 %v360_v52, %v359_v51  ;;  %v5141_v51 = vpack.c.bf16 %v372_v46, %v371_v45  ;;  %v4604_v52 = vld [vmem:[%s5459_s1 + $0xb8] sm:$0xff]   ;;  %v4611_v45 = vld [vmem:[%s5459_s1 + $0x1f0] sm:$0xff]   ;;  %v5198_v46 = vpack.c.bf16 %v386_v38, %v385_v37 }
  0x78   : > { %4078 = vmatprep.subr.bf16.mxu0 %v4585_v2  ;;  %v2442_v37 = vld [vmem:[#allocation2 + $0x91] sm:$0xff]  ;;  %v2443_v38 = vld [vmem:[#allocation2 + $0x99] sm:$0xff] }
  0x7b   : > { %4079 = vmatpush3.bf16.msra.mxu0 %v4585_v2  ;;  %v362_v2 = vld [vmem:[#allocation2 + $0x50] sm:$0xff] }
  0x7c   : > { %4080 = vmatprep.subr.bf16.mxu0 %v4587_v11 }
  0x7d   : > { %3825 = vmatmul.mubr.bf16.gmra.mrb[20].mxu1 %v5030_v12 }
  0x7e   : > { %4049 = vmatmul.mubr.bf16.gmra.mrb[4].mxu0 %v5032_v13  ;;  %3828 = vmatprep.mubr.bf16.mxu1 %v5034_v14 }
  0x7f   : > { %4052 = vmatprep.mubr.bf16.mxu0 %v5036_v15  ;;  %4081 = vmatpush3.bf16.msra.mxu0 %v4587_v11  ;;  %v5103_v11 = vpack.c.bf16 %v362_v2, %v361_v60  ;;  %v375_v60 = vld [vmem:[#allocation2 + $0xf0] sm:$0xff]  ;;  %v376_v2 = vld [vmem:[#allocation2 + $0xf8] sm:$0xff] }
  0x80   : > { %4082 = vmatprep.subr.bf16.mxu0 %v4589_v17  ;;  %v5156_v5 = vpack.c.bf16 %v376_v2, %v375_v60  ;;  %v4612_v60 = vld [vmem:[%s5459_s1 + $0xd8] sm:$0xff]   ;;  %v4614_v2 = vld [vmem:[%s5459_s1 + $0xe0] sm:$0xff]  }
  0x83   : > { %4083 = vmatpush3.bf16.msra.mxu0 %v4589_v17  ;;  %v5107_v17 = vpack.c.bf16 %v364_v7, %v363_v6  ;;  %v4601_v6 = vld [vmem:[%s5459_s1 + $0x1c8] sm:$0xff]  }
  0x84   : > { %4084 = vmatprep.subr.bf16.mxu0 %v4591_v25  ;;  %v377_v7 = vld [vmem:[#allocation2 + $0x108] sm:$0xff] }
  0x85   : > { %3829 = vmatmul.mubr.bf16.gmra.mrb[24].mxu1 %v5048_v26 }
  0x86   : > { %4053 = vmatmul.mubr.bf16.gmra.mrb[8].mxu0 %v5050_v27  ;;  %3832 = vmatprep.mubr.bf16.mxu1 %v5052_v28 }
  0x87   : > { %4056 = vmatprep.mubr.bf16.mxu0 %v5054_v29  ;;  %4085 = vmatpush3.bf16.msra.mxu0 %v4591_v25  ;;  %v1849_v25 = vld [vmem:[#allocation2 + $0x16a] sm:$0xff] }
  0x88   : > { %4086 = vmatprep.subr.bf16.mxu0 %v4593_v32  ;;  %v5127_v35 = vpack.c.bf16 %v1850_v30, %v1849_v25  ;;  %v4607_v25 = vld [vmem:[%s5459_s1 + $0x1e0] sm:$0xff]  }
  0x8b   : > { %4087 = vmatpush3.bf16.msra.mxu0 %v4593_v32  ;;  %v5121_v32 = vpack.c.bf16 %v366_v19, %v365_v18  ;;  %v4603_v18 = vld [vmem:[%s5459_s1 + $0x1d0] sm:$0xff]  }
  0x8c   : > { %4088 = vmatprep.subr.bf16.mxu0 %v4595_v40 }
  0x8d   : > { %3833 = vmatmul.mubr.bf16.gmra.mrb[28].mxu1 %v5066_v41 }
  0x8e   : > { %4057 = vmatmul.mubr.bf16.gmra.mrb[12].mxu0 %v5068_v42  ;;  %3852 = vmatprep.mubr.bf16.mxu1 %v387_v43  ;;  %v1852_v43 = vld [vmem:[#allocation2 + $0x18a] sm:$0xff] }
  0x8f   : > { %4060 = vmatprep.mubr.bf16.mxu0 %v5070_v44  ;;  %4089 = vmatpush3.bf16.msra.mxu0 %v4595_v40  ;;  %v1851_v40 = vld [vmem:[#allocation2 + $0x182] sm:$0xff] }
  0x90   : > { %4090 = vmatprep.subr.bf16.mxu0 %v4597_v47  ;;  %v1868_v50 = vpack.c.bf16 %v1852_v43, %v1851_v40  ;;  %v902_v40 = vld [vmem:[#allocation2 + $0x2] sm:$0xff]  ;;  %v903_v43 = vld [vmem:[#allocation2 + $0xa] sm:$0xff] }
  0x93   : > { %4091 = vmatpush3.bf16.msra.mxu0 %v4597_v47  ;;  %v4602_v47 = vld [vmem:[%s5459_s1 + $0xb0] sm:$0xff]  }
  0x94   : > { %4124 = vmatprep.subr.bf16.mxu0 %v5081_v55 }
  0x95   : > { %3853 = vmatmul.mubr.bf16.vlgmr.msra.gmra.mrb[0].mxu1 %v5083_v56 }
  0x96   : > { %4061 = vmatmul.mubr.bf16.gmra.mrb[16].mxu0 %v5085_v57  ;;  %3885 = vmatpush3.bf16.msra.mxu1 %v5011_v62  ;;  %v5109_v62 = vpack.c.bf16 %v1846_v10, %v1845_v8  ;;  %v378_v8 = vld [vmem:[#allocation2 + $0x110] sm:$0xff]  ;;  %v380_v10 = vld [vmem:[#allocation2 + $0x128] sm:$0xff] }
  0x97   : > { %3856 = vmatprep.mubr.bf16.mxu1 %v5087_v58  ;;  %4064 = vmatprep.mubr.bf16.mxu0 %v5089_v59  ;;  %v5170_v19 = vpack.c.bf16 %v378_v8, %v377_v7  ;;  %v2434_v7 = vld [vmem:[#allocation2 + $0x31] sm:$0xff]  ;;  %v2435_v8 = vld [vmem:[#allocation2 + $0x39] sm:$0xff] }
  0x98   : > { %3886 = vmatprep.subr.bf16.mxu1 %v4592_v3 }
  0x9a   : > { %3887 = vmatpush3.bf16.msra.mxu1 %v4592_v3  ;;  %v5152_v3 = vld [vmem:[%s5459_s1 + $0xc0] sm:$0xff]  }
  0x9b   : > { %3888 = vmatprep.subr.bf16.mxu1 %v4594_v9 }
  0x9d   : > { %3857 = vmatmul.mubr.bf16.gmra.mrb[4].mxu1 %v5103_v11 }
  0x9e   : > { %4065 = vmatmul.mubr.bf16.gmra.mrb[20].mxu0 %v5105_v16  ;;  %3860 = vmatprep.mubr.bf16.mxu1 %v5107_v17 }
  0x9f   : > { %4068 = vmatprep.mubr.bf16.mxu0 %v5109_v62  ;;  %3889 = vmatpush3.bf16.msra.mxu1 %v4594_v9  ;;  %v379_v9 = vld [vmem:[#allocation2 + $0x120] sm:$0xff] }
  0xa0   : > { %3890 = vmatprep.subr.bf16.mxu1 %v4596_v20 }
  0xa3   : > { %3891 = vmatpush3.bf16.msra.mxu1 %v4596_v20  ;;  %v5172_v20 = vpack.c.bf16 %v380_v10, %v379_v9  ;;  %v4618_v9 = vld [vmem:[%s5459_s1 + $0xf0] sm:$0xff]  }
  0xa4   : > { %3892 = vmatprep.subr.bf16.mxu1 %v4598_v31 }
  0xa5   : > { %3861 = vmatmul.mubr.bf16.gmra.mrb[8].mxu1 %v5121_v32 }
  0xa6   : > { %4069 = vmatmul.mubr.bf16.gmra.mrb[24].mxu0 %v5123_v33  ;;  %3864 = vmatprep.mubr.bf16.mxu1 %v5125_v34 }
  0xa7   : > { %4072 = vmatprep.mubr.bf16.mxu0 %v5127_v35  ;;  %3893 = vmatpush3.bf16.msra.mxu1 %v4598_v31  ;;  %v5186_v31 = vpack.c.bf16 %v384_v24, %v383_v23 }
  0xa8   : > { %3894 = vmatprep.subr.bf16.mxu1 %v4600_v36 }
  0xab   : > { %3895 = vmatpush3.bf16.msra.mxu1 %v4600_v36  ;;  %v4609_v36 = vld [vmem:[%s5459_s1 + $0x1e8] sm:$0xff]  }
  0xac   : > { %3896 = vmatprep.subr.bf16.mxu1 %v4602_v47 }
  0xad   : > { %3865 = vmatmul.mubr.bf16.gmra.mrb[12].mxu1 %v5139_v48 }
  0xae   : > { %4073 = vmatmul.mubr.bf16.gmra.mrb[28].mxu0 %v1868_v50  ;;  %3868 = vmatprep.mubr.bf16.mxu1 %v5141_v51  ;;  %v4613_v50 = vld [vmem:[%s5459_s1 + $0x1f8] sm:$0xff]  }
  0xaf   : > { %4092 = vmatprep.mubr.bf16.mxu0 %v5087_v58  ;;  %3897 = vmatpush3.bf16.msra.mxu1 %v4602_v47  ;;  %v934_v47 = vpack.c.bf16 %v903_v43, %v902_v40  ;;  %v4619_v40 = vld [vmem:[%s5459_s1 + $0x210] sm:$0xff]  }
  0xb0   : > { %3898 = vmatprep.subr.bf16.mxu1 %v4604_v52 }
  0xb3   : > { %3899 = vmatpush3.bf16.msra.mxu1 %v4604_v52  ;;  %v4615_v52 = vld [vmem:[%s5459_s1 + $0x200] sm:$0xff]  }
  0xb4   : > { %3932 = vmatprep.subr.bf16.mxu1 %v5152_v3 }
  0xb5   : > { %3869 = vmatmul.mubr.bf16.gmra.mrb[16].mxu1 %v5154_v4 }
  0xb6   : > { %4093 = vmatmul.mubr.bf16.vlgmr.msra.gmra.mrb[0].mxu0 %v5103_v11  ;;  %3872 = vmatprep.mubr.bf16.mxu1 %v5156_v5 }
  0xb7   : > { %4125 = vmatpush3.bf16.msra.mxu0 %v5081_v55  ;;  %4096 = vmatprep.mubr.bf16.mxu0 %v5107_v17  ;;  %v381_v55 = vld [vmem:[#allocation2 + $0x138] sm:$0xff] }
  0xb8   : > { %4126 = vmatprep.subr.bf16.mxu0 %v4601_v6  ;;  %v5184_v30 = vpack.c.bf16 %v382_v22, %v381_v55  ;;  %v2438_v55 = vld [vmem:[#allocation2 + $0x61] sm:$0xff]  ;;  %v2439_v22 = vld [vmem:[#allocation2 + $0x69] sm:$0xff] }
  0xb9   : > { %v2468_v24 = vpack.c.bf16 %v2439_v22, %v2438_v55  ;;  %v2757_v55 = vld [vmem:[#allocation2 + $0xfa] sm:$0xff] }
  0xbb   : > { %4127 = vmatpush3.bf16.msra.mxu0 %v4601_v6  ;;  %v2159_v6 = vld [vmem:[#allocation2 + $0x1a0] sm:$0xff] }
  0xbc   : > { %4128 = vmatprep.subr.bf16.mxu0 %v4603_v18 }
  0xbd   : > { %3873 = vmatmul.mubr.bf16.gmra.mrb[20].mxu1 %v5170_v19 }
  0xbe   : > { %4097 = vmatmul.mubr.bf16.gmra.mrb[4].mxu0 %v5121_v32  ;;  %3876 = vmatprep.mubr.bf16.mxu1 %v5172_v20 }
  0xbf   : > { %4100 = vmatprep.mubr.bf16.mxu0 %v5125_v34  ;;  %4129 = vmatpush3.bf16.msra.mxu0 %v4603_v18  ;;  %v2466_v18 = vpack.c.bf16 %v2435_v8, %v2434_v7  ;;  %v2750_v7 = vld [vmem:[#allocation2 + $0xaa] sm:$0xff]  ;;  %v2751_v8 = vld [vmem:[#allocation2 + $0xb2] sm:$0xff] }
  0xc0   : > { %4130 = vmatprep.subr.bf16.mxu0 %v4605_v21 }
  0xc3   : > { %4131 = vmatpush3.bf16.msra.mxu0 %v4605_v21  ;;  %v2437_v21 = vld [vmem:[#allocation2 + $0x51] sm:$0xff] }
  0xc4   : > { %4132 = vmatprep.subr.bf16.mxu0 %v4607_v25 }
  0xc5   : > { %3877 = vmatmul.mubr.bf16.gmra.mrb[24].mxu1 %v5184_v30 }
  0xc6   : > { %4101 = vmatmul.mubr.bf16.gmra.mrb[8].mxu0 %v5139_v48  ;;  %3880 = vmatprep.mubr.bf16.mxu1 %v5186_v31 }
  0xc7   : > { %4104 = vmatprep.mubr.bf16.mxu0 %v5141_v51  ;;  %4133 = vmatpush3.bf16.msra.mxu0 %v4607_v25  ;;  %v4617_v25 = vld [vmem:[%s5459_s1 + $0x208] sm:$0xff]  }
  0xc8   : > { %4134 = vmatprep.subr.bf16.mxu0 %v4609_v36 }
  0xcb   : > { %4135 = vmatpush3.bf16.msra.mxu0 %v4609_v36  ;;  %v2441_v36 = vld [vmem:[#allocation2 + $0x81] sm:$0xff] }
  0xcc   : > { %4136 = vmatprep.subr.bf16.mxu0 %v4611_v45 }
  0xcd   : > { %3881 = vmatmul.mubr.bf16.gmra.mrb[28].mxu1 %v5198_v46 }
  0xce   : > { %4105 = vmatmul.mubr.bf16.gmra.mrb[12].mxu0 %v5154_v4  ;;  %3900 = vmatprep.mubr.bf16.mxu1 %v934_v47  ;;  %v2447_v47 = vld [vmem:[#allocation2 + $0xc9] sm:$0xff] }
  0xcf   : > { %4108 = vmatprep.mubr.bf16.mxu0 %v5156_v5  ;;  %4137 = vmatpush3.bf16.msra.mxu0 %v4611_v45  ;;  %v2470_v45 = vpack.c.bf16 %v2443_v38, %v2442_v37  ;;  %v2761_v37 = vld [vmem:[#allocation2 + $0x12a] sm:$0xff] }
  0xd0   : > { %4138 = vmatprep.subr.bf16.mxu0 %v4613_v50 }
  0xd3   : > { %4139 = vmatpush3.bf16.msra.mxu0 %v4613_v50  ;;  %v4622_v50 = vld [vmem:[%s5459_s1 + $0x220] sm:$0xff]  }
  0xd4   : > { %4172 = vmatprep.subr.bf16.mxu0 %v4615_v52 }
  0xd5   : > { %3901 = vmatmul.mubr.bf16.vlgmr.msra.gmra.mrb[0].mxu1 %v4993_v49  ;;  %v2156_v49 = vld [vmem:[#allocation2 + $0x180] sm:$0xff] }
  0xd6   : > { %4109 = vmatmul.mubr.bf16.gmra.mrb[16].mxu0 %v5170_v19  ;;  %3933 = vmatpush3.bf16.msra.mxu1 %v5152_v3 }
  0xd7   : > { %3904 = vmatprep.mubr.bf16.mxu1 %v5013_v63  ;;  %4112 = vmatprep.mubr.bf16.mxu0 %v5172_v20  ;;  %v2157_v63 = vld [vmem:[#allocation2 + $0x188] sm:$0xff] }
  0xd8   : > { %3934 = vmatprep.subr.bf16.mxu1 %v4608_v53  ;;  %v5230_v3 = vpack.c.bf16 %v2157_v63, %v2156_v49 }
  0xda   : > { %3935 = vmatpush3.bf16.msra.mxu1 %v4608_v53  ;;  %v4623_v53 = vld [vmem:[%s5459_s1 + $0x228] sm:$0xff]  }
  0xdb   : > { %3936 = vmatprep.subr.bf16.mxu1 %v4610_v54 }
  0xdd   : > { %3905 = vmatmul.mubr.bf16.gmra.mrb[4].mxu1 %v5017_v1  ;;  %v4616_v1 = vld [vmem:[%s5459_s1 + $0xe8] sm:$0xff]  }
  0xde   : > { %4113 = vmatmul.mubr.bf16.gmra.mrb[20].mxu0 %v5184_v30  ;;  %3908 = vmatprep.mubr.bf16.mxu1 %v5032_v13  ;;  %v2158_v13 = vld [vmem:[#allocation2 + $0x198] sm:$0xff] }
  0xdf   : > { %4116 = vmatprep.mubr.bf16.mxu0 %v5186_v31  ;;  %3937 = vmatpush3.bf16.msra.mxu1 %v4610_v54  ;;  %v2175_v10 = vpack.c.bf16 %v2159_v6, %v2158_v13  ;;  %v2745_v54 = vld [vmem:[#allocation2 + $0x6a] sm:$0xff] }
  0xe0   : > { %3938 = vmatprep.subr.bf16.mxu1 %v4612_v60 }
  0xe3   : > { %3939 = vmatpush3.bf16.msra.mxu1 %v4612_v60  ;;  %v4633_v60 = vld [vmem:[%s5459_s1 + $0x138] sm:$0xff]  }
  0xe4   : > { %3940 = vmatprep.subr.bf16.mxu1 %v4614_v2 }
  0xe5   : > { %3909 = vmatmul.mubr.bf16.gmra.mrb[8].mxu1 %v5036_v15  ;;  %v4620_v15 = vld [vmem:[%s5459_s1 + $0xf8] sm:$0xff]  }
  0xe6   : > { %4117 = vmatmul.mubr.bf16.gmra.mrb[24].mxu0 %v5198_v46  ;;  %3912 = vmatprep.mubr.bf16.mxu1 %v5050_v27  ;;  %v2436_v27 = vld [vmem:[#allocation2 + $0x49] sm:$0xff] }
  0xe7   : > { %4120 = vmatprep.mubr.bf16.mxu0 %v5230_v3  ;;  %3941 = vmatpush3.bf16.msra.mxu1 %v4614_v2  ;;  %v2467_v23 = vpack.c.bf16 %v2437_v21, %v2436_v27  ;;  %v2748_v2 = vld [vmem:[#allocation2 + $0x92] sm:$0xff] }
  0xe8   : > { %3942 = vmatprep.subr.bf16.mxu1 %v4616_v1  ;;  %v1531_v27 = vld [vmem:[#allocation2 + $0xd9] sm:$0xff] }
  0xe9   : > { %v2756_v21 = vld [vmem:[#allocation2 + $0xf2] sm:$0xff] }
  0xeb   : > { %3943 = vmatpush3.bf16.msra.mxu1 %v4616_v1  ;;  %v2749_v1 = vld [vmem:[#allocation2 + $0x9a] sm:$0xff] }
  0xec   : > { %3944 = vmatprep.subr.bf16.mxu1 %v4618_v9  ;;  %v2776_v6 = vpack.c.bf16 %v2749_v1, %v2748_v2 }
  0xed   : > { %3913 = vmatmul.mubr.bf16.gmra.mrb[12].mxu1 %v5054_v29  ;;  %v4626_v29 = vld [vmem:[%s5459_s1 + $0x100] sm:$0xff]  }
  0xee   : > { %4121 = vmatmul.mubr.bf16.gmra.mrb[28].mxu0 %v2175_v10  ;;  %3916 = vmatprep.mubr.bf16.mxu1 %v5068_v42  ;;  %v2440_v42 = vld [vmem:[#allocation2 + $0x79] sm:$0xff]  ;;  %v2777_v10 = vpack.c.bf16 %v2751_v8, %v2750_v7 }
  0xef   : > { %4140 = vmatprep.mubr.bf16.mxu0 %v2466_v18  ;;  %3945 = vmatpush3.bf16.msra.mxu1 %v4618_v9  ;;  %v2469_v43 = vpack.c.bf16 %v2441_v36, %v2440_v42  ;;  %v2752_v9 = vld [vmem:[#allocation2 + $0xc2] sm:$0xff]  ;;  %v1536_v42 = vld [vmem:[#allocation2 + $0x111] sm:$0xff] }
  0xf0   : > { %3946 = vmatprep.subr.bf16.mxu1 %v4620_v15  ;;  %v2760_v36 = vld [vmem:[#allocation2 + $0x122] sm:$0xff] }
  0xf3   : > { %3947 = vmatpush3.bf16.msra.mxu1 %v4620_v15  ;;  %v2755_v15 = vld [vmem:[#allocation2 + $0xe2] sm:$0xff] }
  0xf4   : > { %4220 = vmatprep.subr.bf16.mxu1 %v4626_v29 }
  0xf5   : > { %3917 = vmatmul.mubr.bf16.gmra.mrb[16].mxu1 %v5070_v44  ;;  %v4621_v44 = vld [vmem:[%s5459_s1 + $0x218] sm:$0xff]  }
  0xf6   : > { %4141 = vmatmul.mubr.bf16.vlgmr.msra.gmra.mrb[0].mxu0 %v2467_v23  ;;  %3920 = vmatprep.mubr.bf16.mxu1 %v5085_v57  ;;  %v2446_v57 = vld [vmem:[#allocation2 + $0xc1] sm:$0xff]  ;;  %v2780_v23 = vpack.c.bf16 %v2757_v55, %v2756_v21 }
  0xf7   : > { %4173 = vmatpush3.bf16.msra.mxu0 %v4615_v52  ;;  %4144 = vmatprep.mubr.bf16.mxu0 %v2468_v24  ;;  %v2472_v52 = vpack.c.bf16 %v2447_v47, %v2446_v57  ;;  %v1533_v24 = vld [vmem:[#allocation2 + $0xf1] sm:$0xff]  ;;  %v2762_v57 = vld [vmem:[#allocation2 + $0x13a] sm:$0xff]  ;;  %v2763_v47 = vld [vmem:[#allocation2 + $0x142] sm:$0xff] }
  0xf8   : > { %4174 = vmatprep.subr.bf16.mxu0 %v4617_v25 }
  0xfb   : > { %4175 = vmatpush3.bf16.msra.mxu0 %v4617_v25  ;;  %v1534_v25 = vld [vmem:[#allocation2 + $0xf9] sm:$0xff] }
  0xfc   : > { %4176 = vmatprep.subr.bf16.mxu0 %v4619_v40  ;;  %v1556_v38 = vpack.c.bf16 %v1534_v25, %v1533_v24 }
  0xfd   : > { %3921 = vmatmul.mubr.bf16.gmra.mrb[20].mxu1 %v5089_v59  ;;  %v4624_v59 = vld [vmem:[%s5459_s1 + $0x230] sm:$0xff]  }
  0xfe   : > { %4145 = vmatmul.mubr.bf16.gmra.mrb[4].mxu0 %v2469_v43  ;;  %3924 = vmatprep.mubr.bf16.mxu1 %v5105_v16  ;;  %v4625_v16 = vld [vmem:[%s5459_s1 + $0x238] sm:$0xff]  }
  0xff   : > { %4148 = vmatprep.mubr.bf16.mxu0 %v2470_v45  ;;  %4177 = vmatpush3.bf16.msra.mxu0 %v4619_v40  ;;  %v2782_v45 = vpack.c.bf16 %v2761_v37, %v2760_v36 }
 0x100   : > { %4178 = vmatprep.subr.bf16.mxu0 %v4621_v44 }
 0x103   : > { %4179 = vmatpush3.bf16.msra.mxu0 %v4621_v44  ;;  %v1537_v44 = vld [vmem:[#allocation2 + $0x121] sm:$0xff] }
 0x104   : > { %4180 = vmatprep.subr.bf16.mxu0 %v4622_v50 }
 0x105   : > { %3925 = vmatmul.mubr.bf16.gmra.mrb[24].mxu1 %v5109_v62  ;;  %v4631_v62 = vld [vmem:[%s5459_s1 + $0x128] sm:$0xff]  }
 0x106   : > { %4149 = vmatmul.mubr.bf16.gmra.mrb[8].mxu0 %v4978_v39  ;;  %3928 = vmatprep.mubr.bf16.mxu1 %v5123_v33  ;;  %v4627_v39 = vld [vmem:[%s5459_s1 + $0x108] sm:$0xff]  }
 0x107   : > { %4152 = vmatprep.mubr.bf16.mxu0 %v2472_v52  ;;  %4181 = vmatpush3.bf16.msra.mxu0 %v4622_v50  ;;  %v1539_v50 = vld [vmem:[#allocation2 + $0x139] sm:$0xff]  ;;  %v1540_v52 = vld [vmem:[#allocation2 + $0x141] sm:$0xff] }
 0x108   : > { %4182 = vmatprep.subr.bf16.mxu0 %v4623_v53 }
 0x10b   : > { %4183 = vmatpush3.bf16.msra.mxu0 %v4623_v53  ;;  %v2764_v53 = vld [vmem:[#allocation2 + $0x152] sm:$0xff] }
 0x10c   : > { %4184 = vmatprep.subr.bf16.mxu0 %v4624_v59 }
 0x10d   : > { %3929 = vmatmul.mubr.bf16.gmra.mrb[28].mxu1 %v5127_v35  ;;  %v2743_v35 = vld [vmem:[#allocation2 + $0x52] sm:$0xff] }
 0x10e   : > { %4153 = vmatmul.mubr.bf16.gmra.mrb[12].mxu0 %v5006_v61  ;;  %3948 = vmatprep.mubr.bf16.mxu1 %v5083_v56  ;;  %v4628_v61 = vld [vmem:[%s5459_s1 + $0x110] sm:$0xff]  }
 0x10f   : > { %4156 = vmatprep.mubr.bf16.mxu0 %v5015_v0  ;;  %4185 = vmatpush3.bf16.msra.mxu0 %v4624_v59  ;;  %v2462_v0 = vld [vmem:[#allocation2 + $0x181] sm:$0xff] }
 0x110   : > { %4186 = vmatprep.subr.bf16.mxu0 %v4625_v16  ;;  %v2765_v59 = vld [vmem:[#allocation2 + $0x15a] sm:$0xff] }
 0x113   : > { %4187 = vmatpush3.bf16.msra.mxu0 %v4625_v16 }
 0x115   : > { %3949 = vmatmul.mubr.bf16.vlgmr.msra.gmra.mrb[0].mxu1 %v5087_v58  ;;  %v4630_v58 = vld [vmem:[%s5459_s1 + $0x120] sm:$0xff]  }
 0x116   : > { %4157 = vmatmul.mubr.bf16.gmra.mrb[16].mxu0 %v5030_v12  ;;  %4228 = vmatpush3.bf16.msra.mxu1 %v4626_v29  ;;  %v2463_v12 = vld [vmem:[#allocation2 + $0x189] sm:$0xff]  ;;  %v2759_v29 = vld [vmem:[#allocation2 + $0x112] sm:$0xff] }
 0x117   : > { %3952 = vmatprep.mubr.bf16.mxu1 %v5103_v11  ;;  %4160 = vmatprep.mubr.bf16.mxu0 %v5034_v14  ;;  %v4629_v14 = vld [vmem:[%s5459_s1 + $0x118] sm:$0xff]   ;;  %v5299_v56 = vpack.c.bf16 %v2463_v12, %v2462_v0  ;;  %v2784_v0 = vpack.c.bf16 %v2765_v59, %v2764_v53 }
 0x118   : > { %4221 = vmatprep.subr.bf16.mxu1 %v4627_v39  ;;  %v2740_v11 = vld [vmem:[#allocation2 + $0x32] sm:$0xff] }
 0x119   : > { %v1541_v12 = vld [vmem:[#allocation2 + $0x151] sm:$0xff] }
 0x11a   : > { %4229 = vmatpush3.bf16.msra.mxu1 %v4627_v39  ;;  %v2783_v39 = vpack.c.bf16 %v2763_v47, %v2762_v57 }
 0x11b   : > { %4222 = vmatprep.subr.bf16.mxu1 %v4628_v61 }
 0x11d   : > { %3953 = vmatmul.mubr.bf16.gmra.mrb[4].mxu1 %v5107_v17  ;;  %v2741_v17 = vld [vmem:[#allocation2 + $0x3a] sm:$0xff] }
 0x11e   : > { %4161 = vmatmul.mubr.bf16.gmra.mrb[20].mxu0 %v5048_v26  ;;  %3956 = vmatprep.mubr.bf16.mxu1 %v5121_v32  ;;  %v2464_v26 = vld [vmem:[#allocation2 + $0x199] sm:$0xff]  ;;  %v2772_v33 = vpack.c.bf16 %v2741_v17, %v2740_v11  ;;  %v1544_v11 = vld [vmem:[#allocation2 + $0x171] sm:$0xff]  ;;  %v2768_v17 = vld [vmem:[#allocation2 + $0x182] sm:$0xff] }
 0x11f   : > { %4164 = vmatprep.mubr.bf16.mxu0 %v5052_v28  ;;  %4230 = vmatpush3.bf16.msra.mxu1 %v4628_v61  ;;  %v2465_v28 = vld [vmem:[#allocation2 + $0x1a1] sm:$0xff]  ;;  %v1559_v61 = vpack.c.bf16 %v1540_v52, %v1539_v50 }
 0x120   : > { %4223 = vmatprep.subr.bf16.mxu1 %v4629_v14  ;;  %v2481_v32 = vpack.c.bf16 %v2465_v28, %v2464_v26  ;;  %v2767_v26 = vld [vmem:[#allocation2 + $0x172] sm:$0xff]  ;;  %v1543_v28 = vld [vmem:[#allocation2 + $0x169] sm:$0xff] }
 0x123   : > { %4231 = vmatpush3.bf16.msra.mxu1 %v4629_v14  ;;  %v1542_v14 = vld [vmem:[#allocation2 + $0x159] sm:$0xff] }
 0x124   : > { %4224 = vmatprep.subr.bf16.mxu1 %v4630_v58 }
 0x125   : > { %3957 = vmatmul.mubr.bf16.gmra.mrb[8].mxu1 %v5125_v34  ;;  %v2742_v34 = vld [vmem:[#allocation2 + $0x4a] sm:$0xff] }
 0x126   : > { %4165 = vmatmul.mubr.bf16.gmra.mrb[24].mxu0 %v5066_v41  ;;  %3960 = vmatprep.mubr.bf16.mxu1 %v5139_v48  ;;  %v4632_v41 = vld [vmem:[%s5459_s1 + $0x130] sm:$0xff]   ;;  %v2744_v48 = vld [vmem:[#allocation2 + $0x62] sm:$0xff]  ;;  %v2773_v49 = vpack.c.bf16 %v2743_v35, %v2742_v34  ;;  %v2770_v35 = vld [vmem:[#allocation2 + $0x19a] sm:$0xff] }
 0x127   : > { %4168 = vmatprep.mubr.bf16.mxu0 %v5299_v56  ;;  %4232 = vmatpush3.bf16.msra.mxu1 %v4630_v58  ;;  %v2774_v63 = vpack.c.bf16 %v2745_v54, %v2744_v48  ;;  %v2766_v58 = vld [vmem:[#allocation2 + $0x16a] sm:$0xff]  ;;  %v2771_v48 = vld [vmem:[#allocation2 + $0x1a2] sm:$0xff] }
 0x128   : > { %4225 = vmatprep.subr.bf16.mxu1 %v4631_v62  ;;  %v2787_v54 = vpack.c.bf16 %v2771_v48, %v2770_v35 }
 0x12b   : > { %4233 = vmatpush3.bf16.msra.mxu1 %v4631_v62  ;;  %v2769_v62 = vld [vmem:[#allocation2 + $0x18a] sm:$0xff] }
 0x12c   : > { %4226 = vmatprep.subr.bf16.mxu1 %v4632_v41  ;;  %v2786_v34 = vpack.c.bf16 %v2769_v62, %v2768_v17 }
 0x12d   : > { %3961 = vmatmul.mubr.bf16.gmra.mrb[12].mxu1 %v5141_v51  ;;  %v2746_v51 = vld [vmem:[#allocation2 + $0x7a] sm:$0xff] }
 0x12e   : > { %4169 = vmatmul.mubr.bf16.gmra.mrb[28].mxu0 %v2481_v32  ;;  %3964 = vmatprep.mubr.bf16.mxu1 %v5154_v4  ;;  %v2747_v4 = vld [vmem:[#allocation2 + $0x82] sm:$0xff]  ;;  %v1560_v32 = vpack.c.bf16 %v1542_v14, %v1541_v12 }
 0x12f   : > { %4188 = vmatprep.mubr.bf16.mxu0 %v2772_v33  ;;  %4234 = vmatpush3.bf16.msra.mxu1 %v4632_v41  ;;  %v2775_v13 = vpack.c.bf16 %v2747_v4, %v2746_v51  ;;  %v2785_v33 = vpack.c.bf16 %v2767_v26, %v2766_v58  ;;  %v1561_v41 = vpack.c.bf16 %v1544_v11, %v1543_v28 }
 0x130   : > { %4227 = vmatprep.subr.bf16.mxu1 %v4633_v60 }
 0x133   : > { %4235 = vmatpush3.bf16.msra.mxu1 %v4633_v60 }
 0x135   : > { %3965 = vmatmul.mubr.bf16.gmra.mrb[16].mxu1 %v5156_v5  ;;  %v2753_v5 = vld [vmem:[#allocation2 + $0xca] sm:$0xff] }
 0x136   : > { %4189 = vmatmul.mubr.bf16.vlgmr.msra.gmra.mrb[0].mxu0 %v2773_v49  ;;  %3968 = vmatprep.mubr.bf16.mxu1 %v5170_v19  ;;  %v2778_v18 = vpack.c.bf16 %v2753_v5, %v2752_v9  ;;  %v2754_v19 = vld [vmem:[#allocation2 + $0xda] sm:$0xff] }
 0x137   : > { %4192 = vmatprep.mubr.bf16.mxu0 %v2774_v63 }
 0x13d   : > { %3969 = vmatmul.mubr.bf16.gmra.mrb[20].mxu1 %v5172_v20  ;;  %v1532_v20 = vld [vmem:[#allocation2 + $0xe1] sm:$0xff] }
 0x13e   : > { %4193 = vmatmul.mubr.bf16.gmra.mrb[4].mxu0 %v2775_v13  ;;  %3972 = vmatprep.mubr.bf16.mxu1 %v5184_v30  ;;  %v2779_v30 = vpack.c.bf16 %v2755_v15, %v2754_v19  ;;  %v1555_v22 = vpack.c.bf16 %v1532_v20, %v1531_v27 }
 0x13f   : > { %4196 = vmatprep.mubr.bf16.mxu0 %v2776_v6 }
 0x145   : > { %3973 = vmatmul.mubr.bf16.gmra.mrb[24].mxu1 %v5186_v31  ;;  %v2758_v31 = vld [vmem:[#allocation2 + $0x10a] sm:$0xff] }
 0x146   : > { %4197 = vmatmul.mubr.bf16.gmra.mrb[8].mxu0 %v2777_v10  ;;  %3976 = vmatprep.mubr.bf16.mxu1 %v5198_v46  ;;  %v1535_v46 = vld [vmem:[#allocation2 + $0x109] sm:$0xff]  ;;  %v2781_v40 = vpack.c.bf16 %v2759_v29, %v2758_v31 }
 0x147   : > { %4200 = vmatprep.mubr.bf16.mxu0 %v2778_v18  ;;  %v1557_v43 = vpack.c.bf16 %v1536_v42, %v1535_v46 }
 0x14d   : > { %3977 = vmatmul.mubr.bf16.gmra.mrb[28].mxu1 %v5230_v3  ;;  %v1538_v3 = vld [vmem:[#allocation2 + $0x129] sm:$0xff] }
 0x14e   : > { %4201 = vmatmul.mubr.bf16.gmra.mrb[12].mxu0 %v2779_v30  ;;  %4012 = vmatprep.mubr.bf16.mxu1 %v1555_v22  ;;  %v1558_v16 = vpack.c.bf16 %v1538_v3, %v1537_v44 }
 0x14f   : > { %4204 = vmatprep.mubr.bf16.mxu0 %v2780_v23 }
 0x155   : > { %4013 = vmatmul.mubr.bf16.vlgmr.msra.gmra.mrb[16].mxu1 %v1556_v38 }
 0x156   : > { %4205 = vmatmul.mubr.bf16.gmra.mrb[16].mxu0 %v2781_v40  ;;  %4016 = vmatprep.mubr.bf16.mxu1 %v1557_v43 }
 0x157   : > { %4208 = vmatprep.mubr.bf16.mxu0 %v2782_v45 }
 0x15d   : > { %4017 = vmatmul.mubr.bf16.gmra.mrb[20].mxu1 %v1558_v16 }
 0x15e   : > { %4209 = vmatmul.mubr.bf16.gmra.mrb[20].mxu0 %v2783_v39  ;;  %4020 = vmatprep.mubr.bf16.mxu1 %v1559_v61 }
 0x15f   : > { %4212 = vmatprep.mubr.bf16.mxu0 %v2784_v0 }
 0x165   : > { %4021 = vmatmul.mubr.bf16.gmra.mrb[24].mxu1 %v1560_v32 }
 0x166   : > { %4213 = vmatmul.mubr.bf16.gmra.mrb[24].mxu0 %v2785_v33  ;;  %4024 = vmatprep.mubr.bf16.mxu1 %v1561_v41 }
 0x167   : > { %4216 = vmatprep.mubr.bf16.mxu0 %v2786_v34 }
 0x16d   : > { %4025 = vmatmul.mubr.bf16.gmra.mrb[28].mxu1 %v5299_v56 }
 0x16e   : > { %4217 = vmatmul.mubr.bf16.gmra.mrb[28].mxu0 %v2787_v54 }
 0x1e8   : > { %v3950_v60 = vpop.f32.mrb[0].mxu1 }
 0x1e9   : > { %v1356_v49 = vpop.f32.mrb[1].mxu1 }
 0x1ea   : > { %v3951_v63 = vpop.f32.mrb[2].mxu1 }
 0x1eb   : > { %v1359_v51 = vpop.f32.mrb[3].mxu1 }
 0x1f0   : > { %v3954_v4 = vpop.f32.mrb[4].mxu1 }
 0x1f1   : > { %v1372_v2 = vpop.f32.mrb[5].mxu1 }
 0x1f2   : > { %v3955_v1 = vpop.f32.mrb[6].mxu1 }
 0x1f3   : > { %v1375_v13 = vpop.f32.mrb[7].mxu1 }
 0x1f8   : > { %v3958_v6 = vpop.f32.mrb[8].mxu1 }
 0x1f9   : > { %v1388_v7 = vpop.f32.mrb[9].mxu1 }
 0x1fa   : > { %v3959_v8 = vpop.f32.mrb[10].mxu1 }
 0x1fb   : > { %v1391_v9 = vpop.f32.mrb[11].mxu1 }
 0x200   : > { %v5327_v5 = vpop.f32.mrb[12].mxu1 }
 0x201   : > { %v5329_v56 = vpop.f32.mrb[13].mxu1 }
 0x202   : > { %v5331_v10 = vpop.f32.mrb[14].mxu1 }
 0x203   : > { %v5333_v18 = vpop.f32.mrb[15].mxu1 }
 0x209   : > { %v4190_v19 = vpop.f32.mrb[0].mxu0 }
 0x20a   : > { %v4236_v15 = vadd.f32 %v4190_v19, %v3950_v60  ;;  %v2887_v27 = vpop.f32.mrb[1].mxu0 }
 0x20b   : > { %v4237_v20 = vadd.f32 %v2887_v27, %v1356_v49  ;;  %v4191_v21 = vpop.f32.mrb[2].mxu0 }
 0x20c   : > { %3048 = vst [vmem:[%s4894_s6 + $0x10] sm:$0xff] %v4236_v15  ;;  %v4238_v55 = vadd.f32 %v4191_v21, %v3951_v63  ;;  %v2890_v30 = vpop.f32.mrb[3].mxu0  ;;  %v3117_v31 = vmul.f32 %v4236_v15, %v4236_v15 }
 0x20d   : > { %3046 = vst [vmem:[%s4894_s6] sm:$0xff] %v4237_v20  ;;  %v4239_v22 = vadd.f32 %v2890_v30, %v1359_v51  ;;  %v3115_v23 = vmul.f32 %v4237_v20, %v4237_v20 }
 0x20e   : > { %3049 = vst [vmem:[%s4894_s6 + $0x18] sm:$0xff] %v4238_v55  ;;  %v3118_v38 = vmul.f32 %v4238_v55, %v4238_v55 }
 0x20f   : > { %3047 = vst [vmem:[%s4894_s6 + $0x8] sm:$0xff] %v4239_v22  ;;  %v3078_v24 = vadd.f32 %v4239_v22, %v4237_v20  ;;  %v3116_v25 = vmul.f32 %v4239_v22, %v4239_v22 }
 0x211   : > { %v3079_v29 = vadd.f32 %v4236_v15, %v3078_v24  ;;  %v3147_v46 = vadd.f32 %v3116_v25, %v3115_v23  ;;  %v4194_v42 = vpop.f32.mrb[4].mxu0 }
 0x212   : > { %v4240_v36 = vadd.f32 %v4194_v42, %v3954_v4  ;;  %v2903_v37 = vpop.f32.mrb[5].mxu0 }
 0x213   : > { %v3148_v40 = vadd.f32 %v3147_v46, %v3117_v31  ;;  %v4241_v43 = vadd.f32 %v2903_v37, %v1372_v2  ;;  %v3080_v45 = vadd.f32 %v4238_v55, %v3079_v29  ;;  %v4195_v44 = vpop.f32.mrb[6].mxu0 }
 0x214   : > { %3052 = vst [vmem:[%s4894_s6 + $0x30] sm:$0xff] %v4240_v36  ;;  %v4242_v3 = vadd.f32 %v4195_v44, %v3955_v1  ;;  %v2906_v57 = vpop.f32.mrb[7].mxu0  ;;  %v3121_v61 = vmul.f32 %v4240_v36, %v4240_v36 }
 0x215   : > { %3050 = vst [vmem:[%s4894_s6 + $0x20] sm:$0xff] %v4241_v43  ;;  %v3081_v47 = vadd.f32 %v4241_v43, %v3080_v45  ;;  %v3119_v50 = vmul.f32 %v4241_v43, %v4241_v43  ;;  %v3149_v52 = vadd.f32 %v3148_v40, %v3118_v38  ;;  %v4243_v53 = vadd.f32 %v2906_v57, %v1375_v13 }
 0x216   : > { %3053 = vst [vmem:[%s4894_s6 + $0x38] sm:$0xff] %v4242_v3  ;;  %v3122_v28 = vmul.f32 %v4242_v3, %v4242_v3 }
 0x217   : > { %v3150_v59 = vadd.f32 %v3149_v52, %v3119_v50  ;;  %3051 = vst [vmem:[%s4894_s6 + $0x28] sm:$0xff] %v4243_v53  ;;  %v3082_v16 = vadd.f32 %v4243_v53, %v3081_v47  ;;  %v3120_v39 = vmul.f32 %v4243_v53, %v4243_v53 }
 0x219   : > { %v3083_v0 = vadd.f32 %v4240_v36, %v3082_v16  ;;  %v3151_v12 = vadd.f32 %v3150_v59, %v3120_v39  ;;  %v4198_v14 = vpop.f32.mrb[8].mxu0 }
 0x21a   : > { %v4244_v58 = vadd.f32 %v4198_v14, %v3958_v6  ;;  %v2919_v26 = vpop.f32.mrb[9].mxu0 }
 0x21b   : > { %v3152_v11 = vadd.f32 %v3151_v12, %v3121_v61  ;;  %v4245_v17 = vadd.f32 %v2919_v26, %v1388_v7  ;;  %v3084_v62 = vadd.f32 %v4242_v3, %v3083_v0  ;;  %v4199_v32 = vpop.f32.mrb[10].mxu0 }
 0x21c   : > { %3056 = vst [vmem:[%s4894_s6 + $0x50] sm:$0xff] %v4244_v58  ;;  %v4246_v33 = vadd.f32 %v4199_v32, %v3959_v8  ;;  %v2922_v41 = vpop.f32.mrb[11].mxu0  ;;  %v3125_v51 = vmul.f32 %v4244_v58, %v4244_v58 }
 0x21d   : > { %3054 = vst [vmem:[%s4894_s6 + $0x40] sm:$0xff] %v4245_v17  ;;  %v3085_v34 = vadd.f32 %v4245_v17, %v3084_v62  ;;  %v3123_v35 = vmul.f32 %v4245_v17, %v4245_v17  ;;  %v3153_v48 = vadd.f32 %v3152_v11, %v3122_v28  ;;  %v4247_v54 = vadd.f32 %v2922_v41, %v1391_v9 }
 0x21e   : > { %3057 = vst [vmem:[%s4894_s6 + $0x58] sm:$0xff] %v4246_v33  ;;  %v3126_v7 = vmul.f32 %v4246_v33, %v4246_v33 }
 0x21f   : > { %v3154_v60 = vadd.f32 %v3153_v48, %v3123_v35  ;;  %3055 = vst [vmem:[%s4894_s6 + $0x48] sm:$0xff] %v4247_v54  ;;  %v3086_v49 = vadd.f32 %v4247_v54, %v3085_v34  ;;  %v3124_v63 = vmul.f32 %v4247_v54, %v4247_v54 }
 0x221   : > { %v3087_v4 = vadd.f32 %v4244_v58, %v3086_v49  ;;  %v3155_v2 = vadd.f32 %v3154_v60, %v3124_v63  ;;  %v4202_v1 = vpop.f32.mrb[12].mxu0 }
 0x222   : > { %v4248_v13 = vadd.f32 %v4202_v1, %v5327_v5  ;;  %v2935_v6 = vpop.f32.mrb[13].mxu0 }
 0x223   : > { %v3156_v8 = vadd.f32 %v3155_v2, %v3125_v51  ;;  %v4249_v9 = vadd.f32 %v2935_v6, %v5329_v56  ;;  %v3088_v19 = vadd.f32 %v4246_v33, %v3087_v4  ;;  %v4203_v15 = vpop.f32.mrb[14].mxu0 }
 0x224   : > { %3060 = vst [vmem:[%s4894_s6 + $0x70] sm:$0xff] %v4248_v13  ;;  %v4250_v27 = vadd.f32 %v4203_v15, %v5331_v10  ;;  %v2938_v20 = vpop.f32.mrb[15].mxu0  ;;  %v3129_v56 = vmul.f32 %v4248_v13, %v4248_v13 }
 0x225   : > { %3058 = vst [vmem:[%s4894_s6 + $0x60] sm:$0xff] %v4249_v9  ;;  %v3089_v21 = vadd.f32 %v4249_v9, %v3088_v19  ;;  %v3127_v55 = vmul.f32 %v4249_v9, %v4249_v9  ;;  %v3157_v30 = vadd.f32 %v3156_v8, %v3126_v7  ;;  %v4251_v22 = vadd.f32 %v2938_v20, %v5333_v18 }
 0x226   : > { %3061 = vst [vmem:[%s4894_s6 + $0x78] sm:$0xff] %v4250_v27  ;;  %v3130_v38 = vmul.f32 %v4250_v27, %v4250_v27 }
 0x227   : > { %v3158_v5 = vadd.f32 %v3157_v30, %v3127_v55  ;;  %3059 = vst [vmem:[%s4894_s6 + $0x68] sm:$0xff] %v4251_v22  ;;  %v3090_v23 = vadd.f32 %v4251_v22, %v3089_v21  ;;  %v3128_v24 = vmul.f32 %v4251_v22, %v4251_v22 }
 0x228   : > { %v4014_v25 = vpop.f32.mrb[16].mxu1 }
 0x229   : > { %v3091_v31 = vadd.f32 %v4248_v13, %v3090_v23  ;;  %v3159_v29 = vadd.f32 %v3158_v5, %v3128_v24  ;;  %v4206_v46 = vpop.f32.mrb[16].mxu0  ;;  %v1726_v10 = vpop.f32.mrb[17].mxu1 }
 0x22a   : > { %v4252_v42 = vadd.f32 %v4206_v46, %v4014_v25  ;;  %v2951_v36 = vpop.f32.mrb[17].mxu0  ;;  %v4015_v37 = vpop.f32.mrb[18].mxu1 }
 0x22b   : > { %v3160_v18 = vadd.f32 %v3159_v29, %v3129_v56  ;;  %v4253_v40 = vadd.f32 %v2951_v36, %v1726_v10  ;;  %v3092_v43 = vadd.f32 %v4250_v27, %v3091_v31  ;;  %v4207_v45 = vpop.f32.mrb[18].mxu0  ;;  %v1729_v44 = vpop.f32.mrb[19].mxu1 }
 0x22c   : > { %3064 = vst [vmem:[%s4894_s6 + $0x90] sm:$0xff] %v4252_v42  ;;  %v4254_v3 = vadd.f32 %v4207_v45, %v4015_v37  ;;  %v2954_v57 = vpop.f32.mrb[19].mxu0  ;;  %v3133_v0 = vmul.f32 %v4252_v42, %v4252_v42 }
 0x22d   : > { %3062 = vst [vmem:[%s4894_s6 + $0x80] sm:$0xff] %v4253_v40  ;;  %v3093_v47 = vadd.f32 %v4253_v40, %v3092_v43  ;;  %v3131_v50 = vmul.f32 %v4253_v40, %v4253_v40  ;;  %v3161_v52 = vadd.f32 %v3160_v18, %v3130_v38  ;;  %v4255_v53 = vadd.f32 %v2954_v57, %v1729_v44 }
 0x22e   : > { %3065 = vst [vmem:[%s4894_s6 + $0x98] sm:$0xff] %v4254_v3  ;;  %v3134_v62 = vmul.f32 %v4254_v3, %v4254_v3 }
 0x22f   : > { %v3162_v59 = vadd.f32 %v3161_v52, %v3131_v50  ;;  %3063 = vst [vmem:[%s4894_s6 + $0x88] sm:$0xff] %v4255_v53  ;;  %v3094_v16 = vadd.f32 %v4255_v53, %v3093_v47  ;;  %v3132_v39 = vmul.f32 %v4255_v53, %v4255_v53 }
 0x230   : > { %v4018_v61 = vpop.f32.mrb[20].mxu1 }
 0x231   : > { %v3095_v12 = vadd.f32 %v4252_v42, %v3094_v16  ;;  %v3163_v14 = vadd.f32 %v3162_v59, %v3132_v39  ;;  %v4210_v58 = vpop.f32.mrb[20].mxu0  ;;  %v1742_v26 = vpop.f32.mrb[21].mxu1 }
 0x232   : > { %v4256_v28 = vadd.f32 %v4210_v58, %v4018_v61  ;;  %v2967_v11 = vpop.f32.mrb[21].mxu0  ;;  %v4019_v17 = vpop.f32.mrb[22].mxu1 }
 0x233   : > { %v3164_v32 = vadd.f32 %v3163_v14, %v3133_v0  ;;  %v4257_v33 = vadd.f32 %v2967_v11, %v1742_v26  ;;  %v3096_v41 = vadd.f32 %v4254_v3, %v3095_v12  ;;  %v4211_v34 = vpop.f32.mrb[22].mxu0  ;;  %v1745_v35 = vpop.f32.mrb[23].mxu1 }
 0x234   : > { %3068 = vst [vmem:[%s4894_s6 + $0xb0] sm:$0xff] %v4256_v28  ;;  %v4258_v48 = vadd.f32 %v4211_v34, %v4019_v17  ;;  %v2970_v54 = vpop.f32.mrb[23].mxu0  ;;  %v3137_v6 = vmul.f32 %v4256_v28, %v4256_v28 }
 0x235   : > { %3066 = vst [vmem:[%s4894_s6 + $0xa0] sm:$0xff] %v4257_v33  ;;  %v3097_v60 = vadd.f32 %v4257_v33, %v3096_v41  ;;  %v3135_v49 = vmul.f32 %v4257_v33, %v4257_v33  ;;  %v3165_v63 = vadd.f32 %v3164_v32, %v3134_v62  ;;  %v4259_v51 = vadd.f32 %v2970_v54, %v1745_v35 }
 0x236   : > { %3069 = vst [vmem:[%s4894_s6 + $0xb8] sm:$0xff] %v4258_v48  ;;  %v3138_v21 = vmul.f32 %v4258_v48, %v4258_v48 }
 0x237   : > { %v3166_v4 = vadd.f32 %v3165_v63, %v3135_v49  ;;  %3067 = vst [vmem:[%s4894_s6 + $0xa8] sm:$0xff] %v4259_v51  ;;  %v3098_v2 = vadd.f32 %v4259_v51, %v3097_v60  ;;  %v3136_v1 = vmul.f32 %v4259_v51, %v4259_v51 }
 0x238   : > { %v4022_v13 = vpop.f32.mrb[24].mxu1 }
 0x239   : > { %v3099_v7 = vadd.f32 %v4256_v28, %v3098_v2  ;;  %v3167_v8 = vadd.f32 %v3166_v4, %v3136_v1  ;;  %v4214_v9 = vpop.f32.mrb[24].mxu0  ;;  %v1758_v19 = vpop.f32.mrb[25].mxu1 }
 0x23a   : > { %v4260_v15 = vadd.f32 %v4214_v9, %v4022_v13  ;;  %v2983_v27 = vpop.f32.mrb[25].mxu0  ;;  %v4023_v20 = vpop.f32.mrb[26].mxu1 }
 0x23b   : > { %v3168_v55 = vadd.f32 %v3167_v8, %v3137_v6  ;;  %v4261_v30 = vadd.f32 %v2983_v27, %v1758_v19  ;;  %v3100_v22 = vadd.f32 %v4258_v48, %v3099_v7  ;;  %v4215_v5 = vpop.f32.mrb[26].mxu0  ;;  %v1761_v23 = vpop.f32.mrb[27].mxu1 }
 0x23c   : > { %3072 = vst [vmem:[%s4894_s6 + $0xd0] sm:$0xff] %v4260_v15  ;;  %v4262_v24 = vadd.f32 %v4215_v5, %v4023_v20  ;;  %v2986_v25 = vpop.f32.mrb[27].mxu0  ;;  %v3141_v38 = vmul.f32 %v4260_v15, %v4260_v15 }
 0x23d   : > { %3070 = vst [vmem:[%s4894_s6 + $0xc0] sm:$0xff] %v4261_v30  ;;  %v3101_v56 = vadd.f32 %v4261_v30, %v3100_v22  ;;  %v3139_v31 = vmul.f32 %v4261_v30, %v4261_v30  ;;  %v3169_v29 = vadd.f32 %v3168_v55, %v3138_v21  ;;  %v4263_v46 = vadd.f32 %v2986_v25, %v1761_v23 }
 0x23e   : > { %3073 = vst [vmem:[%s4894_s6 + $0xd8] sm:$0xff] %v4262_v24  ;;  %v3142_v47 = vmul.f32 %v4262_v24, %v4262_v24 }
 0x23f   : > { %v3170_v10 = vadd.f32 %v3169_v29, %v3139_v31  ;;  %3071 = vst [vmem:[%s4894_s6 + $0xc8] sm:$0xff] %v4263_v46  ;;  %v3102_v42 = vadd.f32 %v4263_v46, %v3101_v56  ;;  %v3140_v36 = vmul.f32 %v4263_v46, %v4263_v46 }
 0x240   : > { %v4026_v37 = vpop.f32.mrb[28].mxu1 }
 0x241   : > { %v3103_v18 = vadd.f32 %v4260_v15, %v3102_v42  ;;  %v3171_v40 = vadd.f32 %v3170_v10, %v3140_v36  ;;  %v4218_v43 = vpop.f32.mrb[28].mxu0  ;;  %v1774_v45 = vpop.f32.mrb[29].mxu1 }
 0x242   : > { %v4264_v44 = vadd.f32 %v4218_v43, %v4026_v37  ;;  %v2999_v3 = vpop.f32.mrb[29].mxu0  ;;  %v4027_v57 = vpop.f32.mrb[30].mxu1 }
 0x243   : > { %v3172_v50 = vadd.f32 %v3171_v40, %v3141_v38  ;;  %v4265_v52 = vadd.f32 %v2999_v3, %v1774_v45  ;;  %v3104_v53 = vadd.f32 %v4262_v24, %v3103_v18  ;;  %v4219_v59 = vpop.f32.mrb[30].mxu0  ;;  %v1777_v16 = vpop.f32.mrb[31].mxu1 }
 0x244   : > { %3076 = vst [vmem:[%s4894_s6 + $0xf0] sm:$0xff] %v4264_v44  ;;  %v4266_v39 = vadd.f32 %v4219_v59, %v4027_v57  ;;  %v3002_v61 = vpop.f32.mrb[31].mxu0 }
 0x245   : > { %3074 = vst [vmem:[%s4894_s6 + $0xe0] sm:$0xff] %v4265_v52  ;;  %v3105_v0 = vadd.f32 %v4265_v52, %v3104_v53  ;;  %v3143_v12 = vmul.f32 %v4265_v52, %v4265_v52  ;;  %v3173_v14 = vadd.f32 %v3172_v50, %v3142_v47  ;;  %v4267_v58 = vadd.f32 %v3002_v61, %v1777_v16 }
 0x246   : > { %3077 = vst [vmem:[%s4894_s6 + $0xf8] sm:$0xff] %v4266_v39 }
 0x247   : > { %v3174_v26 = vadd.f32 %v3173_v14, %v3143_v12  ;;  %3075 = vst [vmem:[%s4894_s6 + $0xe8] sm:$0xff] %v4267_v58  ;;  %v3106_v28 = vadd.f32 %v4267_v58, %v3105_v0  ;;  %v3144_v11 = vmul.f32 %v4267_v58, %v4267_v58 }
 0x248   : > { %4647 = shalt.err (!%p4644_p3)
}
 0x249   : > { %s4648_s6 = scalar_lea.hbm %s5373_s29, 4096  ;;  %s4652_s18 = scalar_lea.hbm %s5460_s2, 8192 }
 0x24a   : > { %p4649_p5 = scmp.ne.s32.totalorder %s5373_s29, %s4648_s6  ;;  %p4653_p9 = scmp.lt.u32.totalorder %s5373_s29, %s5460_s2 }
 0x24b   : > { %p4654_p10 = scmp.lt.u32.totalorder %s4652_s18, %s4648_s6  ;;  %p4656_p12 = scmp.lt.u32.totalorder %s4648_s6, %s5373_s29 }
 0x24c   : > { %p4650_p6 = pnand %p4649_p5, %p4812_p4 }
 0x24d   : > { %p4655_p11 = por %p4654_p10, %p4653_p9 }
 0x24e   : > { %p4651_p7 = pneg %p4650_p6 }
 0x24f   : > { %p4657_p13 = por %p4656_p12, %p4655_p11 }
 0x251   : > { %p4658_p0 = pnand %p4657_p13, %p4651_p7 }
 0x253   : > { %4661 = shalt.err (!%p4658_p0)
}
 0x254   : > { %s4749_s27 = smov 128   ;;  %s4750_s28 = smov 8   ;;  %v3145_v17 = vmul.f32 %v4264_v44, %v4264_v44  ;;  %v3107_v62 = vadd.f32 %v4264_v44, %v3106_v28  ;;  %v3175_v32 = vadd.f32 %v3174_v26, %v3144_v11  ;;  %v3146_v33 = vmul.f32 %v4266_v39, %v4266_v39 }
 0x255   : > { %4492 = dma.vmem_to_hbm [thread:$0]  (%p4812_p4), %s5375_s23, 4096, %s5373_s29, %s3190_s30, %s4749_s27, %s4749_s27, %s4750_s28   ;;  %vm3184_vm0 = vcmask 1040384   ;;  %vm3186_vm1 = vcmask 1041408  }
 0x256   : > { %v3108_v41 = vadd.f32 %v4266_v39, %v3107_v62  ;;  %v3176_v34 = vadd.f32 %v3175_v32, %v3145_v17  ;;  %s3567_s23 = sshll.u32 %s4738_s15, 7  ;;  %s3226_s29 = sshll.u32 %s4898_s7, 4  ;;  %s5411_s29 = int_to_ptr.vmem [resolvable:$true] %s3226_s29 }
 0x257   : > { %s5409_s5 = scalar_lea.hbm %s5461_s3, %s3567_s23  ;;  %s3195_s8 = scalar_lea.sflag [#allocation7], %s4828_s26 }
 0x258   : > { %v3109_v35 = vrot.slane %v3108_v41, 4  ;;  %v3177_v48 = vadd.f32 %v3176_v34, %v3146_v33  ;;  %s4662_s9 = scalar_lea.vmem %s5411_s29, 128  ;;  %s4751_s15 = smov [#allocation6]  }
 0x259   : > { %p4663_p1 = scmp.ne.s32.totalorder %s5411_s29, %s4662_s9  ;;  %s4666_s6 = sshll.u32 %s4751_s15, 4  ;;  %s4667_s6 = int_to_ptr.vmem [resolvable:$false] %s4666_s6 }
 0x25a   : > { %v3110_v54 = vadd.f32 %v3109_v35, %v3108_v41  ;;  %v3178_v60 = vrot.slane %v3177_v48, 4  ;;  %s4668_s10 = scalar_lea.vmem %s4667_s6, 256  ;;  %p4669_p5 = scmp.lt.s32.totalorder %s5411_s29, %s4667_s6 }
 0x25b   : > { %p4664_p2 = pnand %p4663_p1, %p4812_p4  ;;  %p4670_p6 = scmp.lt.s32.totalorder %s4668_s10, %s4662_s9 }
 0x25c   : > { %v3111_v49 = vrot.slane %v3110_v54, 2  ;;  %v3179_v63 = vadd.f32 %v3178_v60, %v3177_v48 }
 0x25d   : > { %p4665_p3 = pneg %p4664_p2  ;;  %p4671_p7 = por %p4670_p6, %p4669_p5 }
 0x25e   : > { %v3112_v51 = vadd.f32 %v3111_v49, %v3110_v54  ;;  %v3180_v4 = vrot.slane %v3179_v63, 2 }
 0x25f   : > { %p4672_p9 = pnand %p4671_p7, %p4665_p3 }
 0x260   : > { %v3113_v2 = vrot.slane %v3112_v51, 1  ;;  %v3181_v1 = vadd.f32 %v3180_v4, %v3179_v63 }
 0x262   : > { %v3182_v13 = vrot.slane %v3181_v1, 1  ;;  %v3114_v6 = vadd.f32 %v3113_v2, %v3112_v51 }
 0x264   : > { %v3183_v7 = vadd.f32 %v3182_v13, %v3181_v1 }
 0x266   : > { %v3185_v8 = vsel %vm3184_vm0, %v3114_v6, %v3183_v7 }
 0x267   : > { %v3187_v9 = vsel %vm3186_vm1, %v3185_v8, 0.0 }
 0x268   : > { %3188 = vst [vmem:[%s4898_s7] sm:$0xff] %v3187_v9 }
 0x269   : > { %4675 = shalt.err (!%p4672_p9)
}
 0x26a   : > { %s4676_s26 = scalar_lea.hbm %s5409_s5, 128  ;;  %s4680_s18 = scalar_lea.hbm %s5461_s3, 256 }
 0x26b   : > { %p4677_p10 = scmp.ne.s32.totalorder %s5409_s5, %s4676_s26  ;;  %p4681_p13 = scmp.lt.u32.totalorder %s5409_s5, %s5461_s3 }
 0x26c   : > { %p4682_p0 = scmp.lt.u32.totalorder %s4680_s18, %s4676_s26  ;;  %p4684_p2 = scmp.lt.u32.totalorder %s4676_s26, %s5409_s5 }
 0x26d   : > { %p4678_p11 = pnand %p4677_p10, %p4812_p4 }
 0x26e   : > { %p4683_p1 = por %p4682_p0, %p4681_p13 }
 0x26f   : > { %p4679_p12 = pneg %p4678_p11 }
 0x270   : > { %p4685_p3 = por %p4684_p2, %p4683_p1 }
 0x272   : > { %p4686_p5 = pnand %p4685_p3, %p4679_p12 }
 0x274   : > { %4689 = shalt.err (!%p4686_p5)
}
 0x275   : > { %4493 = dma.vmem_to_hbm [thread:$0]  (%p4812_p4), %s5411_s29, 128, %s5409_s5, %s3195_s8  }
 0x276 PF: > { %p4503_p6 = scmp.ge.s32.totalorder %s4746_s17, 2  ;;  %s3238_s27 = sand.u32 1, %s4726_s12  }
 0x277   : > { %s3239_s28 = scalar_lea.sflag [#allocation5], %s3238_s27 }
 0x278   : > { %p4497_p7 = pnand %p4503_p6, %p4819_p8 }
 0x27a   : > { %4717 = dma.done.wait (!%p4497_p7), %s3239_s28, 4096  }
 0x27b   : > { %4719 = vsyncadd (!%p4497_p7), %s3239_s28, 4294963200  ;;  %s3248_s23 = scalar_lea.sflag [#allocation7], %s3238_s27 }
 0x27c   : > { %4721 = dma.done.wait (!%p4497_p7), %s3248_s23, 128  }
 0x27d   : > { %4723 = vsyncadd (!%p4497_p7), %s3248_s23, 4294967168  ;;  %s20_s17 = sadd.s32 1, %s4746_s17   ;;  %s5464_s12 = smov %s4730_s13 }
 0x27e   : > { %p17_p9 = scmp.ge.s32.totalorder %s20_s17, 4   ;;  %s5465_s13 = smov %s4734_s14 }
 0x27f   : > { %s5466_s14 = smov %s4825_s25  ;;  %s5467_s15 = smov %s4742_s16 }
 0x280   : > { %s5468_s16 = smov %s5470_s20  ;;  %19 = sbr.rel (!%p17_p9) target bundleno = 6 (0x6), region = 135 }
 0x287   :  { %3253 = vsyncpa [#allocation5], 1 }
 0x288   :  { %3255 = vsyncpa [#allocation5 + $0x1], 1 }
 0x289   :  { %3256 = vsyncpa [#allocation7], 1 }
 0x28a   :  { %3258 = vsyncpa [#allocation7 + $0x1], 1 }
 0x28b   :  { %3259 = vsyncmov [#allocation3] }
 0x28e   :  { %s3260_s22 = vpop.sfrf %3259 }
 0x28f   :  { %p3570_p4 = scmp.ne.s32.totalorder %s3260_s22, 0 }
 0x291   :  { %3264 = shalt.err (%p3570_p4)  }

</bundles_post_ra>
